<compile_context>
chip_gen: v5e
topology: v5e:2x2
jax: 0.10.0
libtpu: 0.0.40
codegen_flags: <defaults>
</compile_context>

<pallas_src>
import jax
import jax.numpy as jnp
from jax.experimental import pallas as pl
from jax.experimental.pallas import tpu as pltpu


def _round_up(x, m):
    return (x + m - 1) // m * m


def _tpu_generation():
    """Best-effort TPU generation detection ('v5', 'v6', 'v7', or 'unknown')."""
    try:
        kind = jax.devices()[0].device_kind.lower()
    except Exception:
        return "unknown"
    if "v7" in kind or "7x" in kind:
        return "v7"
    if "v6" in kind:
        return "v6"
    if "v5" in kind:
        return "v5"
    return "unknown"


# ----------------------------------------------------------------------------- kernels
def _encoder_kernel_resident(x_ref, w1_ref, b1_ref, w2_ref, b2_ref, o_ref):
    """Single-K path: W1 fully resident, no accumulator scratch / RMW needed."""
    # First EncoderBlock: Linear (bf16 MXU, f32 acc) + bias + LeakyReLU(0.2); Dropout(0) = id.
    h = jnp.dot(x_ref[...], w1_ref[...], preferred_element_type=jnp.float32)
    h = h + b1_ref[...]
    h = jnp.where(h > 0, h, 0.2 * h)
    # Second EncoderBlock: Linear + bias + LeakyReLU(0.2); Dropout(0.3) eval = id.
    o = jnp.dot(h.astype(w2_ref.dtype), w2_ref[...],
                preferred_element_type=jnp.float32)
    o = o + b2_ref[...]
    o = jnp.where(o > 0, o, 0.2 * o)
    o_ref[...] = o.astype(o_ref.dtype)


def _encoder_kernel_ktiled(x_ref, w1_ref, b1_ref, w2_ref, b2_ref, o_ref, acc_ref):
    """Multi-K path: first-layer reduction tiled along K (last grid axis, 'arbitrary')."""
    k = pl.program_id(1)

    @pl.when(k == 0)
    def _():
        acc_ref[...] = jnp.zeros_like(acc_ref)

    acc_ref[...] += jnp.dot(x_ref[...], w1_ref[...],
                            preferred_element_type=jnp.float32)

    @pl.when(k == pl.num_programs(1) - 1)
    def _():
        h = acc_ref[...] + b1_ref[...]
        h = jnp.where(h > 0, h, 0.2 * h)
        o = jnp.dot(h.astype(w2_ref.dtype), w2_ref[...],
                    preferred_element_type=jnp.float32)
        o = o + b2_ref[...]
        o = jnp.where(o > 0, o, 0.2 * o)
        o_ref[...] = o.astype(o_ref.dtype)


# ----------------------------------------------------------------------------- wrapper
def prepare_encoder_params(w1, b1, w2, b2, compute_dtype=jnp.bfloat16):
    """One-time (model-load) weight cast/pad so encoder_forward does no per-call
    weight astype/pad HBM passes."""
    d_in, h1 = w1.shape
    h2 = w2.shape[1]
    kp = _round_up(d_in, 128)
    w1c = w1.astype(compute_dtype)
    if kp != d_in:
        w1c = jnp.pad(w1c, ((0, kp - d_in), (0, 0)))
    w2c = w2.astype(compute_dtype)
    b1r = jnp.reshape(b1, (1, h1)).astype(jnp.float32)
    b2r = jnp.reshape(b2, (1, h2)).astype(jnp.float32)
    return {"w1": w1c, "b1": b1r, "w2": w2c, "b2": b2r, "d_in": d_in}


def encoder_forward(x, params, *, compute_dtype=jnp.bfloat16):
    """x: (B, d_in); params: output of prepare_encoder_params."""
    w1p, b1r, w2c, b2r = params["w1"], params["b1"], params["w2"], params["b2"]
    d_in = params["d_in"]
    B = x.shape[0]
    assert x.shape[1] == d_in, (x.shape, d_in)
    Kp = w1p.shape[0]           # d_in rounded up to 128
    h1 = w1p.shape[1]           # 512
    h2 = w2c.shape[1]           # 256
    out_dtype = x.dtype
    cbytes = jnp.dtype(compute_dtype).itemsize
    obytes = jnp.dtype(out_dtype).itemsize

    gen = _tpu_generation()
    is_v7x = gen == "v7"

    # ---- batch tile selection ------------------------------------------------
    if is_v7x:
        # 2 TensorCores: keep >=2 parallel grid steps when B allows, tiles of
        # >=256 rows (256x256 MXU) once B >= 512.
        if B <= 16:
            tile_b = 16
        elif B < 512:
            tile_b = max(16, _round_up(pl.cdiv(B, 2), 16))
        elif B <= 2048:
            tile_b = 256
        else:
            tile_b = 512
    else:
        # v5e/v6e: single TensorCore -> the grid is a serial loop; never split a
        # small batch into extra steps.  Big batches get 256/512-row tiles.
        if B <= 512:
            tile_b = max(16, _round_up(B, 16))
        elif B <= 1024:
            tile_b = 256
        else:
            tile_b = 512

    Bp = _round_up(B, tile_b)

    # ---- VMEM budget (generation-specific) & K tiling --------------------------
    # v7x: 64 MiB physical VMEM per TC -> budget ~44 MiB.  v5e/v6e: 128 MiB -> ~96 MiB.
    vmem_budget = (44 << 20) if is_v7x else (96 << 20)
    fixed = (2 * h1 * h2 * cbytes          # W2 (budget 2 bufs, conservative)
             + 2 * (h1 + h2) * 4           # biases (f32)
             + 2 * tile_b * h2 * obytes    # output tiles (double-buffered)
             + tile_b * h1 * 4             # acc / hidden temporary (f32)
             + tile_b * h2 * 4)            # output temporary (f32)

    def _need(tk):
        return (2 * tile_b * tk * cbytes   # x tiles (double-buffered)
                + 2 * tk * h1 * cbytes     # W1 (budget 2 bufs, conservative)
                + fixed)

    if _need(Kp) <= vmem_budget:
        tile_k = Kp                        # W1 resident -> K grid axis collapses to 1
    else:
        tile_k = 128
        for cand in (8192, 4096, 2048, 1024, 512, 256, 128):
            if _need(cand) <= vmem_budget:
                tile_k = cand
                break

    Kp2 = _round_up(Kp, tile_k)
    if Kp2 != Kp:
        # Rare fallback: re-pad K so tile_k divides it (weights pre-padded to 128 only).
        w1p = jnp.pad(w1p, ((0, Kp2 - Kp), (0, 0)))
    resident = (Kp2 == tile_k)

    # ---- activation prep (pad/cast only when actually needed) ------------------
    if Bp != B or Kp2 != d_in:
        xp = jnp.pad(x.astype(compute_dtype), ((0, Bp - B), (0, Kp2 - d_in)))
    elif x.dtype != compute_dtype:
        xp = x.astype(compute_dtype)
    else:
        xp = x

    n_b = Bp // tile_b
    n_k = Kp2 // tile_k

    vmem_limit = int(min(max(2 * _need(tile_k), 32 << 20),
                         (48 << 20) if is_v7x else (100 << 20)))

    # W2 & biases are grid-invariant -> fetched once; W1 once if resident, else
    # once per batch tile (its block index cycles with k).
    w1_fetches = 1 if resident else n_b
    cost = pl.CostEstimate(
        flops=int(2 * Bp * (Kp2 * h1 + h1 * h2)),
        transcendentals=0,
        bytes_accessed=int(xp.size * cbytes
                           + w1_fetches * w1p.size * cbytes
                           + w2c.size * cbytes
                           + (b1r.size + b2r.size) * 4
                           + Bp * h2 * obytes),
    )

    def _build(single_buffer_consts):
        def const_spec(shape, index_map):
            # Grid-invariant operand: single-buffer it (double-buffering a constant
            # block buys nothing and wastes VMEM).
            if single_buffer_consts:
                return pl.BlockSpec(shape, index_map, pipeline_mode=pl.Buffered(1))
            return pl.BlockSpec(shape, index_map)

        if resident:
            grid = (n_b,)
            in_specs = [
                pl.BlockSpec((tile_b, tile_k), lambda i: (i, 0)),     # x tile
                const_spec((tile_k, h1), lambda i: (0, 0)),           # W1 (resident)
                const_spec((1, h1), lambda i: (0, 0)),                # b1 (f32)
                const_spec((h1, h2), lambda i: (0, 0)),               # W2 (resident)
                const_spec((1, h2), lambda i: (0, 0)),                # b2 (f32)
            ]
            out_specs = pl.BlockSpec((tile_b, h2), lambda i: (i, 0))
            scratch = []
            kernel = _encoder_kernel_resident
            dims = ("parallel",)
        else:
            grid = (n_b, n_k)
            in_specs = [
                pl.BlockSpec((tile_b, tile_k), lambda i, k: (i, k)),  # x tile
                pl.BlockSpec((tile_k, h1), lambda i, k: (k, 0)),      # W1 K-slab
                const_spec((1, h1), lambda i, k: (0, 0)),             # b1 (f32)
                const_spec((h1, h2), lambda i, k: (0, 0)),            # W2 (resident)
                const_spec((1, h2), lambda i, k: (0, 0)),             # b2 (f32)
            ]
            out_specs = pl.BlockSpec((tile_b, h2), lambda i, k: (i, 0))
            scratch = [pltpu.VMEM((tile_b, h1), jnp.float32)]
            kernel = _encoder_kernel_ktiled
            dims = ("parallel", "arbitrary")

        return pl.pallas_call(
            kernel,
            out_shape=jax.ShapeDtypeStruct((Bp, h2), out_dtype),
            grid_spec=pltpu.PrefetchScalarGridSpec(
                num_scalar_prefetch=0,
                grid=grid,
                in_specs=in_specs,
                out_specs=out_specs,
                scratch_shapes=scratch,
            ),
            compiler_params=pltpu.CompilerParams(
                dimension_semantics=dims,
                vmem_limit_bytes=vmem_limit,
            ),
            cost_estimate=cost,
        )

    try:
        out = _build(single_buffer_consts=True)(xp, w1p, b1r, w2c, b2r)
    except Exception:
        # Conservative fallback if this JAX/Mosaic version rejects
        # pipeline_mode=pl.Buffered(1) on a BlockSpec.
        out = _build(single_buffer_consts=False)(xp, w1p, b1r, w2c, b2r)

    return out if Bp == B else out[:B]


# ----------------------------------------------------------------------------- test utils
def init_params(key, input_size, h1=512, h2=256, dtype=jnp.float32):
    """Deterministic init mimicking nn.Linear default (U[-1/sqrt(fan_in), +])."""
    k1, k2, k3, k4 = jax.random.split(key, 4)
    bnd1 = 1.0 / jnp.sqrt(input_size)
    bnd2 = 1.0 / jnp.sqrt(h1)
    w1 = jax.random.uniform(k1, (input_size, h1), dtype, -bnd1, bnd1)
    b1 = jax.random.uniform(k2, (1, h1), dtype, -bnd1, bnd1)
    w2 = jax.random.uniform(k3, (h1, h2), dtype, -bnd2, bnd2)
    b2 = jax.random.uniform(k4, (1, h2), dtype, -bnd2, bnd2)
    return w1, b1, w2, b2


def encoder_ref(x, w1, b1, w2, b2, compute_dtype=jnp.bfloat16):
    """Plain-JAX reference mirroring the kernel's numerics (bf16 matmuls, f32 acc)."""
    h = jnp.dot(x.astype(compute_dtype), w1.astype(compute_dtype),
                preferred_element_type=jnp.float32) + b1.astype(jnp.float32)
    h = jnp.where(h > 0, h, 0.2 * h)
    o = jnp.dot(h.astype(compute_dtype), w2.astype(compute_dtype),
                preferred_element_type=jnp.float32) + b2.astype(jnp.float32)
    o = jnp.where(o > 0, o, 0.2 * o)
    return o.astype(x.dtype)


if __name__ == "__main__":
    key = jax.random.PRNGKey(0)
    kx, kp = jax.random.split(key)

    # Small shapes; hidden dims (512, 256) are fixed by the module.
    # B=50 deliberately exercises the batch-padding / odd-batch path.
    B, input_size = 50, 128
    x = jax.random.normal(kx, (B, input_size), jnp.float32)
    w1, b1, w2, b2 = init_params(kp, input_size)

    params = prepare_encoder_params(w1, b1, w2, b2)   # model-load time cast/pad
    out = encoder_forward(x, params)
    out = jax.block_until_ready(out)

    ref = encoder_ref(x, w1, b1, w2, b2)
    assert out.shape == (B, 256), out.shape
    assert jnp.allclose(out, ref, atol=1e-3, rtol=1e-3), "mismatch vs reference"

    print("KERNEL_OK")
</pallas_src>

<mosaic_0001>
module attributes {stable_mosaic.version = 11 : i64} {
  func.func @_encoder_kernel_resident(%arg0: i32, %arg1: memref<64x128xbf16, #tpu.memory_space<vmem>>, %arg2: memref<128x512xbf16, #tpu.memory_space<vmem>>, %arg3: memref<1x512xf32, #tpu.memory_space<vmem>>, %arg4: memref<512x256xbf16, #tpu.memory_space<vmem>>, %arg5: memref<1x256xf32, #tpu.memory_space<vmem>>, %arg6: memref<64x256xf32, #tpu.memory_space<vmem>>) attributes {dimension_semantics = [#tpu.dimension_semantics<parallel>], iteration_bounds = array<i64: 1>, scalar_prefetch = 0 : i64, scratch_operands = 0 : i64, tpu.core_type = #tpu.core_type<tc>, window_params = [{transform_indices = @transform_0, window_bounds = array<i64: 64, 128>}, {pipeline_mode = #tpu.pipeline_mode<synchronous>, transform_indices = @transform_1, window_bounds = array<i64: 128, 512>}, {pipeline_mode = #tpu.pipeline_mode<synchronous>, transform_indices = @transform_2, window_bounds = array<i64: 1, 512>}, {pipeline_mode = #tpu.pipeline_mode<synchronous>, transform_indices = @transform_3, window_bounds = array<i64: 512, 256>}, {pipeline_mode = #tpu.pipeline_mode<synchronous>, transform_indices = @transform_4, window_bounds = array<i64: 1, 256>}, {transform_indices = @transform_5, window_bounds = array<i64: 64, 256>}]} {
    %c0 = arith.constant 0 : index
    %c0_0 = arith.constant 0 : index
    %0 = vector.load %arg1[%c0, %c0_0] : memref<64x128xbf16, #tpu.memory_space<vmem>>, vector<64x128xbf16>
    %c0_1 = arith.constant 0 : index
    %c0_2 = arith.constant 0 : index
    %1 = vector.load %arg2[%c0_1, %c0_2] : memref<128x512xbf16, #tpu.memory_space<vmem>>, vector<128x512xbf16>
    %cst = arith.constant dense<0.000000e+00> : vector<64x512xf32>
    %2 = tpu.matmul %0, %1, %cst {dimension_numbers = #tpu.dot_dimension_numbers<[1], [0], [0], [1], [0, 0, 1, 1], [], []>} : vector<64x128xbf16>, vector<128x512xbf16>, vector<64x512xf32> -> vector<64x512xf32>
    %c0_3 = arith.constant 0 : index
    %c0_4 = arith.constant 0 : index
    %3 = vector.load %arg3[%c0_3, %c0_4] : memref<1x512xf32, #tpu.memory_space<vmem>>, vector<1x512xf32>
    %4 = vector.broadcast %3 : vector<1x512xf32> to vector<64x512xf32>
    %5 = arith.addf %2, %4 : vector<64x512xf32>
    %cst_5 = arith.constant 0.000000e+00 : f32
    %6 = vector.broadcast %cst_5 : f32 to vector<64x512xf32>
    %7 = arith.cmpf ogt, %5, %6 : vector<64x512xf32>
    %cst_6 = arith.constant 2.000000e-01 : f32
    %8 = vector.broadcast %cst_6 : f32 to vector<64x512xf32>
    %9 = arith.mulf %8, %5 : vector<64x512xf32>
    %10 = arith.select %7, %5, %9 : vector<64x512xi1>, vector<64x512xf32>
    %11 = arith.truncf %10 : vector<64x512xf32> to vector<64x512xbf16>
    %c0_7 = arith.constant 0 : index
    %c0_8 = arith.constant 0 : index
    %12 = vector.load %arg4[%c0_7, %c0_8] : memref<512x256xbf16, #tpu.memory_space<vmem>>, vector<512x256xbf16>
    %cst_9 = arith.constant dense<0.000000e+00> : vector<64x256xf32>
    %13 = tpu.matmul %11, %12, %cst_9 {dimension_numbers = #tpu.dot_dimension_numbers<[1], [0], [0], [1], [0, 0, 1, 1], [], []>} : vector<64x512xbf16>, vector<512x256xbf16>, vector<64x256xf32> -> vector<64x256xf32>
    %c0_10 = arith.constant 0 : index
    %c0_11 = arith.constant 0 : index
    %14 = vector.load %arg5[%c0_10, %c0_11] : memref<1x256xf32, #tpu.memory_space<vmem>>, vector<1x256xf32>
    %15 = vector.broadcast %14 : vector<1x256xf32> to vector<64x256xf32>
    %16 = arith.addf %13, %15 : vector<64x256xf32>
    %cst_12 = arith.constant 0.000000e+00 : f32
    %17 = vector.broadcast %cst_12 : f32 to vector<64x256xf32>
    %18 = arith.cmpf ogt, %16, %17 : vector<64x256xf32>
    %cst_13 = arith.constant 2.000000e-01 : f32
    %19 = vector.broadcast %cst_13 : f32 to vector<64x256xf32>
    %20 = arith.mulf %19, %16 : vector<64x256xf32>
    %21 = arith.select %18, %16, %20 : vector<64x256xi1>, vector<64x256xf32>
    %c0_14 = arith.constant 0 : index
    %c0_15 = arith.constant 0 : index
    %22 = vector.load %arg6[%c0_14, %c0_15] : memref<64x256xf32, #tpu.memory_space<vmem>>, vector<64x256xf32>
    tpu.vector_store %arg6[%c0_14, %c0_15], %21 {strides = array<i32>} : memref<64x256xf32, #tpu.memory_space<vmem>>, vector<64x256xf32>,
    return
  }
  func.func @transform_0(%arg0: i32) -> (i32, i32) {
    %c0_i32 = arith.constant 0 : i32
    %c0_i32_0 = arith.constant 0 : i32
    return %arg0, %c0_i32 : i32, i32
  }
  func.func @transform_1(%arg0: i32) -> (i32, i32) {
    %c0_i32 = arith.constant 0 : i32
    %c0_i32_0 = arith.constant 0 : i32
    %c0_i32_1 = arith.constant 0 : i32
    return %c0_i32, %c0_i32_0 : i32, i32
  }
  func.func @transform_2(%arg0: i32) -> (i32, i32) {
    %c0_i32 = arith.constant 0 : i32
    %c0_i32_0 = arith.constant 0 : i32
    %c0_i32_1 = arith.constant 0 : i32
    return %c0_i32, %c0_i32_0 : i32, i32
  }
  func.func @transform_3(%arg0: i32) -> (i32, i32) {
    %c0_i32 = arith.constant 0 : i32
    %c0_i32_0 = arith.constant 0 : i32
    %c0_i32_1 = arith.constant 0 : i32
    return %c0_i32, %c0_i32_0 : i32, i32
  }
  func.func @transform_4(%arg0: i32) -> (i32, i32) {
    %c0_i32 = arith.constant 0 : i32
    %c0_i32_0 = arith.constant 0 : i32
    %c0_i32_1 = arith.constant 0 : i32
    return %c0_i32, %c0_i32_0 : i32, i32
  }
  func.func @transform_5(%arg0: i32) -> (i32, i32) {
    %c0_i32 = arith.constant 0 : i32
    %c0_i32_0 = arith.constant 0 : i32
    return %arg0, %c0_i32 : i32, i32
  }
}

module attributes {stable_mosaic.version = 11 : i64} {
  func.func @_encoder_kernel_resident(%arg0: i32, %arg1: memref<64x128xbf16, #tpu.memory_space<vmem>>, %arg2: memref<128x512xbf16, #tpu.memory_space<vmem>>, %arg3: memref<1x512xf32, #tpu.memory_space<vmem>>, %arg4: memref<512x256xbf16, #tpu.memory_space<vmem>>, %arg5: memref<1x256xf32, #tpu.memory_space<vmem>>, %arg6: memref<64x256xf32, #tpu.memory_space<vmem>>) attributes {dimension_semantics = [#tpu.dimension_semantics<parallel>], iteration_bounds = array<i64: 1>, scalar_prefetch = 0 : i64, scratch_operands = 0 : i64, tpu.core_type = #tpu.core_type<tc>, window_params = [{transform_indices = @transform_0, window_bounds = array<i64: 64, 128>}, {pipeline_mode = #tpu.pipeline_mode<synchronous>, transform_indices = @transform_1, window_bounds = array<i64: 128, 512>}, {pipeline_mode = #tpu.pipeline_mode<synchronous>, transform_indices = @transform_2, window_bounds = array<i64: 1, 512>}, {pipeline_mode = #tpu.pipeline_mode<synchronous>, transform_indices = @transform_3, window_bounds = array<i64: 512, 256>}, {pipeline_mode = #tpu.pipeline_mode<synchronous>, transform_indices = @transform_4, window_bounds = array<i64: 1, 256>}, {transform_indices = @transform_5, window_bounds = array<i64: 64, 256>}]} {
    %c0 = arith.constant 0 : index
    %c0_0 = arith.constant 0 : index
    %0 = vector.load %arg1[%c0, %c0_0] : memref<64x128xbf16, #tpu.memory_space<vmem>>, vector<64x128xbf16>
    %c0_1 = arith.constant 0 : index
    %c0_2 = arith.constant 0 : index
    %1 = vector.load %arg2[%c0_1, %c0_2] : memref<128x512xbf16, #tpu.memory_space<vmem>>, vector<128x512xbf16>
    %cst = arith.constant dense<0.000000e+00> : vector<64x512xf32>
    %2 = tpu.matmul %0, %1, %cst {dimension_numbers = #tpu.dot_dimension_numbers<[1], [0], [0], [1], [0, 0, 1, 1], [], []>} : vector<64x128xbf16>, vector<128x512xbf16>, vector<64x512xf32> -> vector<64x512xf32>
    %c0_3 = arith.constant 0 : index
    %c0_4 = arith.constant 0 : index
    %3 = vector.load %arg3[%c0_3, %c0_4] : memref<1x512xf32, #tpu.memory_space<vmem>>, vector<1x512xf32>
    %4 = vector.broadcast %3 : vector<1x512xf32> to vector<64x512xf32>
    %5 = arith.addf %2, %4 : vector<64x512xf32>
    %cst_5 = arith.constant 0.000000e+00 : f32
    %6 = vector.broadcast %cst_5 : f32 to vector<64x512xf32>
    %7 = arith.cmpf ogt, %5, %6 : vector<64x512xf32>
    %cst_6 = arith.constant 2.000000e-01 : f32
    %8 = vector.broadcast %cst_6 : f32 to vector<64x512xf32>
    %9 = arith.mulf %8, %5 : vector<64x512xf32>
    %10 = arith.select %7, %5, %9 : vector<64x512xi1>, vector<64x512xf32>
    %11 = arith.truncf %10 : vector<64x512xf32> to vector<64x512xbf16>
    %c0_7 = arith.constant 0 : index
    %c0_8 = arith.constant 0 : index
    %12 = vector.load %arg4[%c0_7, %c0_8] : memref<512x256xbf16, #tpu.memory_space<vmem>>, vector<512x256xbf16>
    %cst_9 = arith.constant dense<0.000000e+00> : vector<64x256xf32>
    %13 = tpu.matmul %11, %12, %cst_9 {dimension_numbers = #tpu.dot_dimension_numbers<[1], [0], [0], [1], [0, 0, 1, 1], [], []>} : vector<64x512xbf16>, vector<512x256xbf16>, vector<64x256xf32> -> vector<64x256xf32>
    %c0_10 = arith.constant 0 : index
    %c0_11 = arith.constant 0 : index
    %14 = vector.load %arg5[%c0_10, %c0_11] : memref<1x256xf32, #tpu.memory_space<vmem>>, vector<1x256xf32>
    %15 = vector.broadcast %14 : vector<1x256xf32> to vector<64x256xf32>
    %16 = arith.addf %13, %15 : vector<64x256xf32>
    %cst_12 = arith.constant 0.000000e+00 : f32
    %17 = vector.broadcast %cst_12 : f32 to vector<64x256xf32>
    %18 = arith.cmpf ogt, %16, %17 : vector<64x256xf32>
    %cst_13 = arith.constant 2.000000e-01 : f32
    %19 = vector.broadcast %cst_13 : f32 to vector<64x256xf32>
    %20 = arith.mulf %19, %16 : vector<64x256xf32>
    %21 = arith.select %18, %16, %20 : vector<64x256xi1>, vector<64x256xf32>
    %c0_14 = arith.constant 0 : index
    %c0_15 = arith.constant 0 : index
    %22 = vector.load %arg6[%c0_14, %c0_15] : memref<64x256xf32, #tpu.memory_space<vmem>>, vector<64x256xf32>
    tpu.vector_store %arg6[%c0_14, %c0_15], %21 {strides = array<i32>} : memref<64x256xf32, #tpu.memory_space<vmem>>, vector<64x256xf32>,
    return
  }
  func.func @transform_0(%arg0: i32) -> (i32, i32) {
    %c0_i32 = arith.constant 0 : i32
    %c0_i32_0 = arith.constant 0 : i32
    return %arg0, %c0_i32 : i32, i32
  }
  func.func @transform_1(%arg0: i32) -> (i32, i32) {
    %c0_i32 = arith.constant 0 : i32
    %c0_i32_0 = arith.constant 0 : i32
    %c0_i32_1 = arith.constant 0 : i32
    return %c0_i32, %c0_i32_0 : i32, i32
  }
  func.func @transform_2(%arg0: i32) -> (i32, i32) {
    %c0_i32 = arith.constant 0 : i32
    %c0_i32_0 = arith.constant 0 : i32
    %c0_i32_1 = arith.constant 0 : i32
    return %c0_i32, %c0_i32_0 : i32, i32
  }
  func.func @transform_3(%arg0: i32) -> (i32, i32) {
    %c0_i32 = arith.constant 0 : i32
    %c0_i32_0 = arith.constant 0 : i32
    %c0_i32_1 = arith.constant 0 : i32
    return %c0_i32, %c0_i32_0 : i32, i32
  }
  func.func @transform_4(%arg0: i32) -> (i32, i32) {
    %c0_i32 = arith.constant 0 : i32
    %c0_i32_0 = arith.constant 0 : i32
    %c0_i32_1 = arith.constant 0 : i32
    return %c0_i32, %c0_i32_0 : i32, i32
  }
  func.func @transform_5(%arg0: i32) -> (i32, i32) {
    %c0_i32 = arith.constant 0 : i32
    %c0_i32_0 = arith.constant 0 : i32
    return %arg0, %c0_i32 : i32, i32
  }
}

</mosaic_0001>

<bundles_post_ra>
// kernel: tpu_custom_call.1
= control target key start
LH: loop header
LB: loop body
LE: loop exit
PB: predicated region body
PF: predicated region fallthrough
CT: control target
= control target key end

     0   :  { %10 = vsyncpa [#allocation3], 0  ;;  %s2066_s0 = inlined_call_operand.hbm [shape: bf16[64,128], index: 0, kind: input, shape index: {}]   ;;  %s2067_s1 = inlined_call_operand.hbm [shape: bf16[128,512], index: 1, kind: input, shape index: {}]   ;;  %s2068_s2 = inlined_call_operand.hbm [shape: f32[1,512], index: 2, kind: input, shape index: {}]   ;;  %s2069_s3 = inlined_call_operand.hbm [shape: bf16[512,256], index: 3, kind: input, shape index: {}]   ;;  %s2070_s4 = inlined_call_operand.vmem [shape: f32[1,256], index: 4, kind: input, shape index: {}]   ;;  %s2071_s5 = inlined_call_operand.hbm [shape: f32[64,256], index: 5, kind: output, shape index: {}]  }
   0x1   :  { %11 = vsyncpa [#allocation6], 0 }
   0x2   :  { %12 = vsyncpa [#allocation9], 0  ;;  %s31_s20 = sshll.u32 %s2067_s1, 4  ;;  %s32_s20 = int_to_ptr.hbm [resolvable:$true] %s31_s20 }
   0x3   :  { %13 = vsyncpa [#allocation4], 0  ;;  %s1890_s21 = smov [#allocation5]   ;;  %s18_s25 = sshll.u32 %s2066_s0, 4  ;;  %s19_s25 = int_to_ptr.hbm [resolvable:$true] %s18_s25 }
   0x4   :  { %s33_s22 = sshll.u32 %s1890_s21, 4  ;;  %s1891_s26 = smov 256   ;;  %s34_s22 = int_to_ptr.vmem [resolvable:$true] %s33_s22 }
   0x5   :  { %s1892_s27 = smov 16   ;;  %s1893_s28 = smov [#allocation2]  }
   0x6   :  { %39 = dma.hbm_to_vmem [thread:$0]  %s32_s20, 4096, %s34_s22, [#allocation6], %s1891_s26, %s1891_s26, %s1892_s27  }
   0x7   :  { %s20_s29 = sshll.u32 %s1893_s28, 4  ;;  %s1894_s1 = smov 64   ;;  %s21_s29 = int_to_ptr.vmem [resolvable:$true] %s20_s29 }
   0x8   :  { %s1895_s30 = smov 4   ;;  %s45_s8 = sshll.u32 %s2068_s2, 4  ;;  %s46_s8 = int_to_ptr.hbm [resolvable:$true] %s45_s8 }
   0x9   :  { %26 = dma.hbm_to_vmem [thread:$0]  %s19_s25, 512, %s21_s29, [#allocation3], %s1894_s1, %s1894_s1, %s1895_s30  }
   0xa   :  { %s1896_s9 = smov [#allocation7]   ;;  %s55_s12 = sshll.u32 %s2069_s3, 4  ;;  %s56_s12 = int_to_ptr.hbm [resolvable:$true] %s55_s12 }
   0xb   :  { %s47_s0 = sshll.u32 %s1896_s9, 4  ;;  %s1897_s13 = smov [#allocation8]   ;;  %s48_s0 = int_to_ptr.vmem [resolvable:$true] %s47_s0 }
   0xc   :  { %50 = dma.hbm_to_vmem [thread:$0]  %s46_s8, 64, %s48_s0, [#allocation6]  }
   0xd   :  { %s57_s14 = sshll.u32 %s1897_s13, 4  ;;  %s1898_s15 = smov 128   ;;  %s58_s14 = int_to_ptr.vmem [resolvable:$true] %s57_s14 }
   0xe   :  { %s1899_s16 = smov 8  }
   0xf   :  { %63 = dma.hbm_to_vmem [thread:$0]  %s56_s12, 8192, %s58_s14, [#allocation9], %s1898_s15, %s1898_s15, %s1899_s16  }
  0x10   :  { %1882 = dma.done.wait [#allocation3], 512  }
  0x11   :  { %1883 = vsyncadd [#allocation3], 4294966784 }
  0x12   :  { %1884 = dma.done.wait [#allocation6], 4160  }
  0x13   :  { %1885 = vsyncadd [#allocation6], 4294963136 }
  0x14   :  { %1886 = dma.done.wait [#allocation9], 8192  }
  0x15   :  { %1887 = vsyncadd [#allocation9], 4294959104  ;;  %v1381_v0 = vld [vmem:[#allocation5 + $0xe0] sm:$0xf]  ;;  %v1685_v1 = vld [vmem:[#allocation5 + $0xec] sm:$0xf0] }
  0x16   :  { %v1683_v2 = vld [vmem:[#allocation5 + $0xe4] sm:$0xf]  ;;  %v1382_v3 = vor.u32 %v1685_v1, %v1381_v0  ;;  %v1383_v4 = vld [vmem:[#allocation5 + $0xf0] sm:$0xf0]  ;;  %v1389_v5 = vld [vmem:[#allocation5 + $0xe8] sm:$0xf] }
  0x17   :  { %v1686_v6 = vld [vmem:[#allocation5 + $0xf4] sm:$0xf0]  ;;  %v1386_v7 = vor.u32 %v1683_v2, %v1383_v4  ;;  %v1684_v9 = vld [vmem:[#allocation5 + $0xec] sm:$0xf]  ;;  %v1391_v10 = vld [vmem:[#allocation5 + $0xf8] sm:$0xf0] }
  0x18   :  { %v1390_v8 = vor.u32 %v1686_v6, %v1389_v5  ;;  %v1365_v11 = vld [vmem:[#allocation5 + $0xc0] sm:$0xf]  ;;  %316 = vmatpush.bf16.msra.mxu0 %v1382_v3  ;;  %v1394_v12 = vor.u32 %v1684_v9, %v1391_v10  ;;  %v1681_v13 = vld [vmem:[#allocation5 + $0xcc] sm:$0xf0]  ;;  %v1679_v14 = vld [vmem:[#allocation5 + $0xc4] sm:$0xf] }
  0x19   :  { %v1367_v15 = vld [vmem:[#allocation5 + $0xd0] sm:$0xf0]  ;;  %345 = vmatpush.bf16.msra.mxu1 %v1386_v7  ;;  %v1366_v16 = vor.u32 %v1681_v13, %v1365_v11  ;;  %v1373_v18 = vld [vmem:[#allocation5 + $0xc8] sm:$0xf]  ;;  %v1682_v19 = vld [vmem:[#allocation5 + $0xd4] sm:$0xf0] }
  0x1a   :  { %374 = vmatpush.bf16.msra.mxu2 %v1390_v8  ;;  %v1370_v17 = vor.u32 %v1679_v14, %v1367_v15  ;;  %v1680_v20 = vld [vmem:[#allocation5 + $0xcc] sm:$0xf]  ;;  %403 = vmatpush.bf16.msra.mxu3 %v1394_v12  ;;  %v1374_v21 = vor.u32 %v1682_v19, %v1373_v18  ;;  %v1375_v22 = vld [vmem:[#allocation5 + $0xd8] sm:$0xf0]  ;;  %v1349_v23 = vld [vmem:[#allocation5 + $0xa0] sm:$0xf] }
  0x1b   :  { %v1677_v24 = vld [vmem:[#allocation5 + $0xac] sm:$0xf0]  ;;  %v1378_v25 = vor.u32 %v1680_v20, %v1375_v22  ;;  %v1675_v26 = vld [vmem:[#allocation5 + $0xa4] sm:$0xf]  ;;  %v1351_v27 = vld [vmem:[#allocation5 + $0xb0] sm:$0xf0] }
  0x1c   :  { %v1357_v28 = vld [vmem:[#allocation5 + $0xa8] sm:$0xf]  ;;  %317 = vmatpush.bf16.msra.mxu0 %v1366_v16  ;;  %v1350_v29 = vor.u32 %v1677_v24, %v1349_v23  ;;  %v1678_v30 = vld [vmem:[#allocation5 + $0xb4] sm:$0xf0]  ;;  %v1676_v31 = vld [vmem:[#allocation5 + $0xac] sm:$0xf]  ;;  %v1354_v33 = vor.u32 %v1675_v26, %v1351_v27 }
  0x1d   :  { %v1359_v32 = vld [vmem:[#allocation5 + $0xb8] sm:$0xf0]  ;;  %346 = vmatpush.bf16.msra.mxu1 %v1370_v17  ;;  %v1358_v34 = vor.u32 %v1678_v30, %v1357_v28  ;;  %v1333_v35 = vld [vmem:[#allocation5 + $0x80] sm:$0xf]  ;;  %v1673_v36 = vld [vmem:[#allocation5 + $0x8c] sm:$0xf0] }
  0x1e   :  { %375 = vmatpush.bf16.msra.mxu2 %v1374_v21  ;;  %v1671_v37 = vld [vmem:[#allocation5 + $0x84] sm:$0xf]  ;;  %404 = vmatpush.bf16.msra.mxu3 %v1378_v25  ;;  %v1362_v38 = vor.u32 %v1676_v31, %v1359_v32  ;;  %v1335_v39 = vld [vmem:[#allocation5 + $0x90] sm:$0xf0]  ;;  %v1341_v40 = vld [vmem:[#allocation5 + $0x88] sm:$0xf]  ;;  %v1334_v44 = vor.u32 %v1673_v36, %v1333_v35 }
  0x1f   :  { %v1674_v41 = vld [vmem:[#allocation5 + $0x94] sm:$0xf0]  ;;  %v1672_v42 = vld [vmem:[#allocation5 + $0x8c] sm:$0xf]  ;;  %v1343_v43 = vld [vmem:[#allocation5 + $0x98] sm:$0xf0]  ;;  %v1338_v45 = vor.u32 %v1671_v37, %v1335_v39 }
  0x20   :  { %318 = vmatpush.bf16.msra.mxu0 %v1350_v29  ;;  %v1342_v46 = vor.u32 %v1674_v41, %v1341_v40  ;;  %v1317_v47 = vld [vmem:[#allocation5 + $0x60] sm:$0xf]  ;;  %v1669_v48 = vld [vmem:[#allocation5 + $0x6c] sm:$0xf0]  ;;  %v1667_v49 = vld [vmem:[#allocation5 + $0x64] sm:$0xf]  ;;  %v1346_v50 = vor.u32 %v1672_v42, %v1343_v43 }
  0x21   :  { %347 = vmatpush.bf16.msra.mxu1 %v1354_v33  ;;  %v1319_v51 = vld [vmem:[#allocation5 + $0x70] sm:$0xf0]  ;;  %v1325_v52 = vld [vmem:[#allocation5 + $0x68] sm:$0xf]  ;;  %v1670_v53 = vld [vmem:[#allocation5 + $0x74] sm:$0xf0]  ;;  %v1318_v56 = vor.u32 %v1669_v48, %v1317_v47 }
  0x22   :  { %376 = vmatpush.bf16.msra.mxu2 %v1358_v34  ;;  %405 = vmatpush.bf16.msra.mxu3 %v1362_v38  ;;  %v1668_v54 = vld [vmem:[#allocation5 + $0x6c] sm:$0xf]  ;;  %v1327_v55 = vld [vmem:[#allocation5 + $0x78] sm:$0xf0]  ;;  %v1322_v57 = vor.u32 %v1667_v49, %v1319_v51  ;;  %v1326_v58 = vor.u32 %v1670_v53, %v1325_v52  ;;  %v1301_v59 = vld [vmem:[#allocation5 + $0x40] sm:$0xf] }
  0x23   :  { %v1665_v60 = vld [vmem:[#allocation5 + $0x4c] sm:$0xf0]  ;;  %v1663_v61 = vld [vmem:[#allocation5 + $0x44] sm:$0xf]  ;;  %v1330_v62 = vor.u32 %v1668_v54, %v1327_v55  ;;  %v1303_v63 = vld [vmem:[#allocation5 + $0x50] sm:$0xf0] }
  0x24   :  { %319 = vmatpush.bf16.msra.mxu0 %v1334_v44  ;;  %v1309_v0 = vld [vmem:[#allocation5 + $0x48] sm:$0xf]  ;;  %v1666_v1 = vld [vmem:[#allocation5 + $0x54] sm:$0xf0]  ;;  %v1664_v2 = vld [vmem:[#allocation5 + $0x4c] sm:$0xf]  ;;  %v1302_v4 = vor.u32 %v1665_v60, %v1301_v59  ;;  %v1306_v5 = vor.u32 %v1663_v61, %v1303_v63 }
  0x25   :  { %348 = vmatpush.bf16.msra.mxu1 %v1338_v45  ;;  %v1311_v3 = vld [vmem:[#allocation5 + $0x58] sm:$0xf0]  ;;  %v1310_v6 = vor.u32 %v1666_v1, %v1309_v0  ;;  %v1285_v7 = vld [vmem:[#allocation5 + $0x20] sm:$0xf]  ;;  %v1661_v8 = vld [vmem:[#allocation5 + $0x2c] sm:$0xf0] }
  0x26   :  { %377 = vmatpush.bf16.msra.mxu2 %v1342_v46  ;;  %406 = vmatpush.bf16.msra.mxu3 %v1346_v50  ;;  %v1659_v9 = vld [vmem:[#allocation5 + $0x24] sm:$0xf]  ;;  %v1314_v10 = vor.u32 %v1664_v2, %v1311_v3  ;;  %v1287_v11 = vld [vmem:[#allocation5 + $0x30] sm:$0xf0]  ;;  %v1293_v12 = vld [vmem:[#allocation5 + $0x28] sm:$0xf]  ;;  %v1286_v16 = vor.u32 %v1661_v8, %v1285_v7 }
  0x27   :  { %v1662_v13 = vld [vmem:[#allocation5 + $0x34] sm:$0xf0]  ;;  %v1660_v14 = vld [vmem:[#allocation5 + $0x2c] sm:$0xf]  ;;  %v1295_v15 = vld [vmem:[#allocation5 + $0x38] sm:$0xf0]  ;;  %v1290_v17 = vor.u32 %v1659_v9, %v1287_v11 }
  0x28   :  { %320 = vmatpush.bf16.msra.mxu0 %v1318_v56  ;;  %v1294_v18 = vor.u32 %v1662_v13, %v1293_v12  ;;  %v1269_v19 = vld [vmem:[#allocation5] sm:$0xf]  ;;  %v1657_v20 = vld [vmem:[#allocation5 + $0xc] sm:$0xf0]  ;;  %v1655_v21 = vld [vmem:[#allocation5 + $0x4] sm:$0xf]  ;;  %v1298_v22 = vor.u32 %v1660_v14, %v1295_v15 }
  0x29   :  { %349 = vmatpush.bf16.msra.mxu1 %v1322_v57  ;;  %v1271_v23 = vld [vmem:[#allocation5 + $0x10] sm:$0xf0]  ;;  %v1277_v24 = vld [vmem:[#allocation5 + $0x8] sm:$0xf]  ;;  %v1658_v25 = vld [vmem:[#allocation5 + $0x14] sm:$0xf0]  ;;  %v1270_v28 = vor.u32 %v1657_v20, %v1269_v19 }
  0x2a   :  { %378 = vmatpush.bf16.msra.mxu2 %v1326_v58  ;;  %407 = vmatpush.bf16.msra.mxu3 %v1330_v62  ;;  %v1656_v26 = vld [vmem:[#allocation5 + $0xc] sm:$0xf]  ;;  %v1279_v27 = vld [vmem:[#allocation5 + $0x18] sm:$0xf0]  ;;  %v1274_v29 = vor.u32 %v1655_v21, %v1271_v23  ;;  %v1278_v30 = vor.u32 %v1658_v25, %v1277_v24  ;;  %v1651_v32 = vld [vmem:[#allocation2] sm:$0xff]  ;;  %s1236_s20 = sshll.u32 %s2071_s5, 4  ;;  %s1237_s20 = int_to_ptr.hbm [resolvable:$true] %s1236_s20 }
  0x2b   :  { %v1282_v31 = vor.u32 %v1656_v26, %v1279_v27  ;;  %v1652_v33 = vld [vmem:[#allocation2 + $0x8] sm:$0xff]  ;;  %v1581_v34 = vld [vmem:[#allocation8 + $0x170] sm:$0xf]  ;;  %v1734_v35 = vld [vmem:[#allocation8 + $0x174] sm:$0xf0] }
  0x2c   :  { %321 = vmatpush.bf16.msra.mxu0 %v1302_v4  ;;  %v1453_v36 = vld [vmem:[#allocation8 + $0x70] sm:$0xf]  ;;  %v1582_v37 = vor.u32 %v1734_v35, %v1581_v34  ;;  %v1702_v38 = vld [vmem:[#allocation8 + $0x74] sm:$0xf0]  ;;  %v1573_v45 = vld [vmem:[#allocation8 + $0x160] sm:$0xf] }
  0x2d   :  { %350 = vmatpush.bf16.msra.mxu1 %v1306_v5  ;;  %v1645_v39 = vld [vmem:[#allocation8 + $0x1f0] sm:$0xf]  ;;  %v1750_v40 = vld [vmem:[#allocation8 + $0x1f4] sm:$0xf0]  ;;  %v1454_v41 = vor.u32 %v1702_v38, %v1453_v36  ;;  %v1732_v47 = vld [vmem:[#allocation8 + $0x164] sm:$0xf0] }
  0x2e   :  { %379 = vmatpush.bf16.msra.mxu2 %v1310_v6  ;;  %408 = vmatpush.bf16.msra.mxu3 %v1314_v10  ;;  %v1646_v42 = vor.u32 %v1750_v40, %v1645_v39  ;;  %v1517_v43 = vld [vmem:[#allocation8 + $0xf0] sm:$0xf]  ;;  %v1718_v44 = vld [vmem:[#allocation8 + $0xf4] sm:$0xf0]  ;;  %v1445_v48 = vld [vmem:[#allocation8 + $0x60] sm:$0xf]  ;;  %v1574_v50 = vor.u32 %v1732_v47, %v1573_v45 }
  0x2f   :  { %v1518_v46 = vor.u32 %v1718_v44, %v1517_v43  ;;  %v1700_v49 = vld [vmem:[#allocation8 + $0x64] sm:$0xf0]  ;;  %v1637_v52 = vld [vmem:[#allocation8 + $0x1e0] sm:$0xf]  ;;  %v1565_v57 = vld [vmem:[#allocation8 + $0x150] sm:$0xf] }
  0x30   :  { %322 = vmatpush.bf16.msra.mxu0 %v1286_v16  ;;  %v1446_v51 = vor.u32 %v1700_v49, %v1445_v48  ;;  %v1748_v53 = vld [vmem:[#allocation8 + $0x1e4] sm:$0xf0]  ;;  %v1509_v54 = vld [vmem:[#allocation8 + $0xe0] sm:$0xf]  ;;  %v1730_v58 = vld [vmem:[#allocation8 + $0x154] sm:$0xf0] }
  0x31   :  { %351 = vmatpush.bf16.msra.mxu1 %v1290_v17  ;;  %v1638_v55 = vor.u32 %v1748_v53, %v1637_v52  ;;  %v1716_v56 = vld [vmem:[#allocation8 + $0xe4] sm:$0xf0]  ;;  %v1437_v60 = vld [vmem:[#allocation8 + $0x50] sm:$0xf]  ;;  %v1698_v61 = vld [vmem:[#allocation8 + $0x54] sm:$0xf0]  ;;  %v1566_v63 = vor.u32 %v1730_v58, %v1565_v57 }
  0x32   :  { %380 = vmatpush.bf16.msra.mxu2 %v1294_v18  ;;  %409 = vmatpush.bf16.msra.mxu3 %v1298_v22  ;;  %v1510_v59 = vor.u32 %v1716_v56, %v1509_v54  ;;  %v1629_v62 = vld [vmem:[#allocation8 + $0x1d0] sm:$0xf]  ;;  %v1746_v0 = vld [vmem:[#allocation8 + $0x1d4] sm:$0xf0]  ;;  %v1438_v4 = vor.u32 %v1698_v61, %v1437_v60  ;;  %v1557_v7 = vld [vmem:[#allocation8 + $0x140] sm:$0xf] }
  0x33   :  { %v1501_v1 = vld [vmem:[#allocation8 + $0xd0] sm:$0xf]  ;;  %v1714_v2 = vld [vmem:[#allocation8 + $0xd4] sm:$0xf0]  ;;  %v1630_v5 = vor.u32 %v1746_v0, %v1629_v62  ;;  %v1728_v8 = vld [vmem:[#allocation8 + $0x144] sm:$0xf0] }
  0x34   :  { %323 = vmatpush.bf16.msra.mxu0 %v1270_v28  ;;  %v1653_v3 = vld [vmem:[#allocation2 + $0x10] sm:$0xff]  ;;  %v1502_v6 = vor.u32 %v1714_v2, %v1501_v1  ;;  %v1429_v9 = vld [vmem:[#allocation8 + $0x40] sm:$0xf]  ;;  %v1696_v10 = vld [vmem:[#allocation8 + $0x44] sm:$0xf0]  ;;  %v1558_v15 = vor.u32 %v1728_v8, %v1557_v7 }
  0x35   :  { %352 = vmatpush.bf16.msra.mxu1 %v1274_v29  ;;  %v1621_v11 = vld [vmem:[#allocation8 + $0x1c0] sm:$0xf]  ;;  %v1744_v12 = vld [vmem:[#allocation8 + $0x1c4] sm:$0xf0]  ;;  %v1430_v16 = vor.u32 %v1696_v10, %v1429_v9  ;;  %v1549_v18 = vld [vmem:[#allocation8 + $0x130] sm:$0xf] }
  0x36   :  { %381 = vmatpush.bf16.msra.mxu2 %v1278_v30  ;;  %410 = vmatpush.bf16.msra.mxu3 %v1282_v31  ;;  %v1493_v13 = vld [vmem:[#allocation8 + $0xc0] sm:$0xf]  ;;  %v1712_v14 = vld [vmem:[#allocation8 + $0xc4] sm:$0xf0]  ;;  %v1622_v17 = vor.u32 %v1744_v12, %v1621_v11  ;;  %v1726_v19 = vld [vmem:[#allocation8 + $0x134] sm:$0xf0] }
  0x37   :  { %324 = vmatmul.bf16.vlgmr.msra.gmra.mxu0 %v1651_v32  ;;  %v1421_v20 = vld [vmem:[#allocation8 + $0x30] sm:$0xf]  ;;  %v1494_v21 = vor.u32 %v1712_v14, %v1493_v13  ;;  %v1694_v22 = vld [vmem:[#allocation8 + $0x34] sm:$0xf0]  ;;  %v1550_v27 = vor.u32 %v1726_v19, %v1549_v18  ;;  %v1541_v30 = vld [vmem:[#allocation8 + $0x120] sm:$0xf] }
  0x38   :  { %353 = vmatmul.bf16.vlgmr.msra.gmra.mxu1 %v1651_v32  ;;  %934 = vmatpush.bf16.msrb.mxu0 %v1454_v41  ;;  %v1613_v23 = vld [vmem:[#allocation8 + $0x1b0] sm:$0xf]  ;;  %v1742_v24 = vld [vmem:[#allocation8 + $0x1b4] sm:$0xf0]  ;;  %v1422_v28 = vor.u32 %v1694_v22, %v1421_v20  ;;  %v1724_v31 = vld [vmem:[#allocation8 + $0x124] sm:$0xf0] }
  0x39   :  { %382 = vmatmul.bf16.vlgmr.msra.gmra.mxu2 %v1651_v32  ;;  %411 = vmatmul.bf16.vlgmr.msra.gmra.mxu3 %v1651_v32  ;;  %v1485_v25 = vld [vmem:[#allocation8 + $0xb0] sm:$0xf]  ;;  %v1710_v26 = vld [vmem:[#allocation8 + $0xb4] sm:$0xf0]  ;;  %v1614_v29 = vor.u32 %v1742_v24, %v1613_v23  ;;  %v1413_v35 = vld [vmem:[#allocation8 + $0x20] sm:$0xf] }
  0x3a   :  { %992 = vmatpush.bf16.msrb.mxu2 %v1582_v37  ;;  %1021 = vmatpush.bf16.msrb.mxu3 %v1646_v42  ;;  %v1486_v32 = vor.u32 %v1710_v26, %v1485_v25  ;;  %v1654_v34 = vld [vmem:[#allocation2 + $0x18] sm:$0xff]  ;;  %v1692_v36 = vld [vmem:[#allocation8 + $0x24] sm:$0xf0]  ;;  %v1605_v37 = vld [vmem:[#allocation8 + $0x1a0] sm:$0xf] }
  0x3b   :  { %963 = vmatpush.bf16.msrb.mxu1 %v1518_v46  ;;  %v1414_v38 = vor.u32 %v1692_v36, %v1413_v35  ;;  %v1740_v39 = vld [vmem:[#allocation8 + $0x1a4] sm:$0xf0]  ;;  %v1477_v40 = vld [vmem:[#allocation8 + $0xa0] sm:$0xf]  ;;  %v1405_v44 = vld [vmem:[#allocation8 + $0x10] sm:$0xf] }
  0x3c   :  { %935 = vmatpush.bf16.msrb.mxu0 %v1446_v51  ;;  %v1708_v41 = vld [vmem:[#allocation8 + $0xa4] sm:$0xf0]  ;;  %v1606_v42 = vor.u32 %v1740_v39, %v1605_v37  ;;  %v1690_v45 = vld [vmem:[#allocation8 + $0x14] sm:$0xf0]  ;;  %v1469_v46 = vld [vmem:[#allocation8 + $0x90] sm:$0xf] }
  0x3d   :  { %v1478_v43 = vor.u32 %v1708_v41, %v1477_v40  ;;  %v1406_v47 = vor.u32 %v1690_v45, %v1405_v44  ;;  %v1706_v48 = vld [vmem:[#allocation8 + $0x94] sm:$0xf0]  ;;  %v1597_v53 = vld [vmem:[#allocation8 + $0x190] sm:$0xf]  ;;  %v1688_v57 = vld [vmem:[#allocation8 + $0x4] sm:$0xf0] }
  0x3e   :  { %993 = vmatpush.bf16.msrb.mxu2 %v1574_v50  ;;  %1022 = vmatpush.bf16.msrb.mxu3 %v1638_v55  ;;  %v1470_v49 = vor.u32 %v1706_v48, %v1469_v46  ;;  %v1533_v50 = vld [vmem:[#allocation8 + $0x110] sm:$0xf]  ;;  %v1722_v51 = vld [vmem:[#allocation8 + $0x114] sm:$0xf0]  ;;  %v1397_v55 = vld [vmem:[#allocation8] sm:$0xf] }
  0x3f   :  { %964 = vmatpush.bf16.msrb.mxu1 %v1510_v59  ;;  %v1534_v52 = vor.u32 %v1722_v51, %v1533_v50  ;;  %v1738_v54 = vld [vmem:[#allocation8 + $0x194] sm:$0xf0]  ;;  %v1461_v58 = vld [vmem:[#allocation8 + $0x80] sm:$0xf]  ;;  %v1704_v59 = vld [vmem:[#allocation8 + $0x84] sm:$0xf0]  ;;  %v1398_v60 = vor.u32 %v1688_v57, %v1397_v55 }
  0x40   :  { %936 = vmatpush.bf16.msrb.mxu0 %v1438_v4  ;;  %v1598_v56 = vor.u32 %v1738_v54, %v1597_v53  ;;  %v1462_v61 = vor.u32 %v1704_v59, %v1461_v58  ;;  %v1525_v62 = vld [vmem:[#allocation8 + $0x100] sm:$0xf]  ;;  %v1736_v2 = vld [vmem:[#allocation8 + $0x184] sm:$0xf0]  ;;  %v1733_v4 = vld [vmem:[#allocation8 + $0x174] sm:$0xf] }
  0x41   :  { %v1589_v0 = vld [vmem:[#allocation8 + $0x180] sm:$0xf]  ;;  %v1701_v7 = vld [vmem:[#allocation8 + $0x74] sm:$0xf]  ;;  %v1455_v8 = vld [vmem:[#allocation8 + $0x78] sm:$0xf0] }
  0x42   :  { %994 = vmatpush.bf16.msrb.mxu2 %v1566_v63  ;;  %1023 = vmatpush.bf16.msrb.mxu3 %v1630_v5  ;;  %v1720_v63 = vld [vmem:[#allocation8 + $0x104] sm:$0xf0]  ;;  %v1583_v5 = vld [vmem:[#allocation8 + $0x178] sm:$0xf0]  ;;  %v1749_v9 = vld [vmem:[#allocation8 + $0x1f4] sm:$0xf]  ;;  %v1458_v10 = vor.u32 %v1701_v7, %v1455_v8 }
  0x43   :  { %965 = vmatpush.bf16.msrb.mxu1 %v1502_v6  ;;  %v1526_v1 = vor.u32 %v1720_v63, %v1525_v62  ;;  %v1586_v6 = vor.u32 %v1733_v4, %v1583_v5  ;;  %v1647_v11 = vld [vmem:[#allocation8 + $0x1f8] sm:$0xf0]  ;;  %v1717_v12 = vld [vmem:[#allocation8 + $0xf4] sm:$0xf]  ;;  %v1575_v23 = vld [vmem:[#allocation8 + $0x168] sm:$0xf0] }
  0x44   :  { %937 = vmatpush.bf16.msrb.mxu0 %v1430_v16  ;;  %v1519_v13 = vld [vmem:[#allocation8 + $0xf8] sm:$0xf0]  ;;  %v1699_v26 = vld [vmem:[#allocation8 + $0x64] sm:$0xf]  ;;  %v1697_v54 = vld [vmem:[#allocation8 + $0x54] sm:$0xf] }
  0x45   :  { %v122_v14 = vld [vmem:[#allocation7] sm:$0xf]  ;;  %v1522_v16 = vor.u32 %v1717_v12, %v1519_v13  ;;  %v1713_v62 = vld [vmem:[#allocation8 + $0xd4] sm:$0xf] }
  0x46   :  { %995 = vmatpush.bf16.msrb.mxu2 %v1558_v15  ;;  %1024 = vmatpush.bf16.msrb.mxu3 %v1622_v17  ;;  %v1650_v15 = vor.u32 %v1749_v9, %v1647_v11  ;;  %v1946_v18 = vperm.slane %v122_v14, 1  ;;  %v1948_v19 = vperm.slane %v122_v14, 0  ;;  %v1952_v37 = vperm.slane %v122_v14, 2  ;;  %v1567_v53 = vld [vmem:[#allocation8 + $0x158] sm:$0xf0] }
  0x47   :  { %329 = vmatmul.bf16.gmra.mxu0 %v1652_v33  ;;  %966 = vmatpush.bf16.msrb.mxu1 %v1494_v21  ;;  %v1731_v21 = vld [vmem:[#allocation8 + $0x164] sm:$0xf]  ;;  %v1954_v41 = vperm.slane %v122_v14, 3  ;;  %v1439_v55 = vld [vmem:[#allocation8 + $0x58] sm:$0xf0] }
  0x48   :  { %358 = vmatmul.bf16.gmra.mxu1 %v1652_v33  ;;  %938 = vmatpush.bf16.msrb.mxu0 %v1422_v28  ;;  %v1578_v25 = vor.u32 %v1731_v21, %v1575_v23  ;;  %v1747_v28 = vld [vmem:[#allocation8 + $0x1e4] sm:$0xf]  ;;  %v1442_v59 = vor.u32 %v1697_v54, %v1439_v55  ;;  %v1559_v23 = vld [vmem:[#allocation8 + $0x148] sm:$0xf0]  ;;  %v1693_v54 = vld [vmem:[#allocation8 + $0x34] sm:$0xf] }
  0x49   :  { %387 = vmatmul.bf16.gmra.mxu2 %v1652_v33  ;;  %416 = vmatmul.bf16.gmra.mxu3 %v1652_v33  ;;  %v1542_v33 = vor.u32 %v1724_v31, %v1541_v30  ;;  %v1639_v30 = vld [vmem:[#allocation8 + $0x1e8] sm:$0xf0]  ;;  %v1715_v31 = vld [vmem:[#allocation8 + $0xe4] sm:$0xf]  ;;  %v1423_v55 = vld [vmem:[#allocation8 + $0x38] sm:$0xf0] }
  0x4a   :  { %996 = vmatpush.bf16.msrb.mxu2 %v1550_v27  ;;  %1025 = vmatpush.bf16.msrb.mxu3 %v1614_v29  ;;  %v1447_v27 = vld [vmem:[#allocation8 + $0x68] sm:$0xf0] }
  0x4b   :  { %967 = vmatpush.bf16.msrb.mxu1 %v1486_v32  ;;  %v1450_v29 = vor.u32 %v1699_v26, %v1447_v27  ;;  %v1511_v32 = vld [vmem:[#allocation8 + $0xe8] sm:$0xf0] }
  0x4c   :  { %939 = vmatpush.bf16.msrb.mxu0 %v1414_v38  ;;  %v1514_v35 = vor.u32 %v1715_v31, %v1511_v32  ;;  %v1711_v31 = vld [vmem:[#allocation8 + $0xc4] sm:$0xf] }
  0x4e   :  { %997 = vmatpush.bf16.msrb.mxu2 %v1542_v33  ;;  %1026 = vmatpush.bf16.msrb.mxu3 %v1606_v42 }
  0x4f   :  { %968 = vmatpush.bf16.msrb.mxu1 %v1478_v43 }
  0x50   :  { %940 = vmatpush.bf16.msrb.mxu0 %v1406_v47 }
  0x52   :  { %998 = vmatpush.bf16.msrb.mxu2 %v1534_v52  ;;  %1027 = vmatpush.bf16.msrb.mxu3 %v1598_v56 }
  0x53   :  { %969 = vmatpush.bf16.msrb.mxu1 %v1470_v49  ;;  %v1729_v49 = vld [vmem:[#allocation8 + $0x154] sm:$0xf] }
  0x54   :  { %941 = vmatpush.bf16.msrb.mxu0 %v1398_v60  ;;  %v1570_v58 = vor.u32 %v1729_v49, %v1567_v53  ;;  %v1745_v60 = vld [vmem:[#allocation8 + $0x1d4] sm:$0xf]  ;;  %v1551_v53 = vld [vmem:[#allocation8 + $0x138] sm:$0xf0] }
  0x55   :  { %v1725_v49 = vld [vmem:[#allocation8 + $0x134] sm:$0xf] }
  0x56   :  { %999 = vmatpush.bf16.msrb.mxu2 %v1526_v1 }
  0x57   :  { %334 = vmatmul.bf16.gmra.mxu0 %v1653_v3  ;;  %970 = vmatpush.bf16.msrb.mxu1 %v1462_v61  ;;  %v1631_v61 = vld [vmem:[#allocation8 + $0x1d8] sm:$0xf0] }
  0x58   :  { %363 = vmatmul.bf16.gmra.mxu1 %v1653_v3  ;;  %1050 = vmatpush.bf16.msra.mxu0 %v1458_v10  ;;  %v1634_v1 = vor.u32 %v1745_v60, %v1631_v61  ;;  %v1426_v60 = vor.u32 %v1693_v54, %v1423_v55  ;;  %v1741_v61 = vld [vmem:[#allocation8 + $0x1b4] sm:$0xf]  ;;  %v1599_v54 = vld [vmem:[#allocation8 + $0x198] sm:$0xf0] }
  0x59   :  { %392 = vmatmul.bf16.gmra.mxu2 %v1653_v3  ;;  %421 = vmatmul.bf16.gmra.mxu3 %v1653_v3  ;;  %v1590_v3 = vor.u32 %v1736_v2, %v1589_v0  ;;  %v1503_v2 = vld [vmem:[#allocation8 + $0xd8] sm:$0xf0] }
  0x5a   :  { %1108 = vmatpush.bf16.msra.mxu2 %v1586_v6  ;;  %v1506_v7 = vor.u32 %v1713_v62, %v1503_v2  ;;  %v1615_v62 = vld [vmem:[#allocation8 + $0x1b8] sm:$0xf0] }
  0x5b   :  { %1028 = vmatpush.bf16.msrb.mxu3 %v1590_v3  ;;  %1079 = vmatpush.bf16.msra.mxu1 %v1522_v16  ;;  %v1727_v16 = vld [vmem:[#allocation8 + $0x144] sm:$0xf] }
  0x5c   :  { %1051 = vmatpush.bf16.msra.mxu0 %v1450_v29  ;;  %v1562_v27 = vor.u32 %v1727_v16, %v1559_v23  ;;  %v1743_v29 = vld [vmem:[#allocation8 + $0x1c4] sm:$0xf] }
  0x5d   :  { %v1723_v23 = vld [vmem:[#allocation8 + $0x124] sm:$0xf] }
  0x5e   :  { %1109 = vmatpush.bf16.msra.mxu2 %v1578_v25  ;;  %v1431_v25 = vld [vmem:[#allocation8 + $0x48] sm:$0xf0] }
  0x5f   :  { %1137 = vmatpush.bf16.msra.mxu3 %v1650_v15  ;;  %1080 = vmatpush.bf16.msra.mxu1 %v1514_v35 }
  0x60   :  { %1052 = vmatpush.bf16.msra.mxu0 %v1442_v59  ;;  %v1554_v59 = vor.u32 %v1725_v49, %v1551_v53  ;;  %v1737_v53 = vld [vmem:[#allocation8 + $0x194] sm:$0xf] }
  0x62   :  { %1110 = vmatpush.bf16.msra.mxu2 %v1570_v58 }
  0x63   :  { %1081 = vmatpush.bf16.msra.mxu1 %v1506_v7 }
  0x66   :  { %1111 = vmatpush.bf16.msra.mxu2 %v1562_v27 }
  0x67   :  { %339 = vmatmul.bf16.gmra.mxu0 %v1654_v34 }
  0x68   :  { %368 = vmatmul.bf16.gmra.mxu1 %v1654_v34 }
  0x69   :  { %397 = vmatmul.bf16.gmra.mxu2 %v1654_v34  ;;  %426 = vmatmul.bf16.gmra.mxu3 %v1654_v34  ;;  %v1642_v34 = vor.u32 %v1747_v28, %v1639_v30  ;;  %v1623_v30 = vld [vmem:[#allocation8 + $0x1c8] sm:$0xf0] }
  0x6a   :  { %1112 = vmatpush.bf16.msra.mxu2 %v1554_v59  ;;  %v1705_v59 = vld [vmem:[#allocation8 + $0x94] sm:$0xf] }
  0x6b   :  { %1138 = vmatpush.bf16.msra.mxu3 %v1642_v34  ;;  %v1495_v34 = vld [vmem:[#allocation8 + $0xc8] sm:$0xf0] }
  0x6f   :  { %1139 = vmatpush.bf16.msra.mxu3 %v1634_v1 }
  0xb4   :  { %v325_v17 = vpop.f32.mrf.mxu0 }
  0xb5   :  { %v354_v20 = vpop.f32.mrf.mxu1  ;;  %v326_v24 = vadd.f32 %v325_v17, %v1948_v19 }
  0xb6   :  { %v355_v22 = vadd.f32 %v354_v20, %v1946_v18 }
  0xb7   :  { %v464_v40 = vmul.f32 0.2, %v326_v24  ;;  %vm432_vm1 = vcmp.gt.f32.partialorder %v326_v24, 0.0 }
  0xb8   :  { %v465_v36 = vmul.f32 0.2, %v355_v22  ;;  %vm433_vm0 = vcmp.gt.f32.partialorder %v355_v22, 0.0 }
  0xb9   :  { %v496_v51 = vsel %vm432_vm1, %v326_v24, %v464_v40  ;;  %v1695_v24 = vld [vmem:[#allocation8 + $0x44] sm:$0xf] }
  0xba   :  { %v497_v48 = vsel %vm433_vm0, %v355_v22, %v465_v36  ;;  %v1434_v28 = vor.u32 %v1695_v24, %v1431_v25 }
  0xbc   :  { %v383_v33 = vpop.f32.mrf.mxu2  ;;  %v412_v38 = vpop.f32.mrf.mxu3  ;;  %1053 = vmatpush.bf16.msra.mxu0 %v1434_v28  ;;  %v1543_v28 = vld [vmem:[#allocation8 + $0x128] sm:$0xf0] }
  0xbd   :  { %v327_v39 = vpop.f32.mrf.mxu0  ;;  %v356_v43 = vpop.f32.mrf.mxu1  ;;  %v384_v46 = vadd.f32 %v383_v33, %v1952_v37  ;;  %v413_v50 = vadd.f32 %v412_v38, %v1954_v41  ;;  %v1626_v33 = vor.u32 %v1743_v29, %v1623_v30  ;;  %v1691_v29 = vld [vmem:[#allocation8 + $0x24] sm:$0xf]  ;;  %v1415_v30 = vld [vmem:[#allocation8 + $0x28] sm:$0xf0] }
  0xbe   :  { %v328_v42 = vadd.f32 %v327_v39, %v1948_v19  ;;  %v357_v44 = vadd.f32 %v356_v43, %v1946_v18  ;;  %v1498_v39 = vor.u32 %v1711_v31, %v1495_v34  ;;  %v1739_v34 = vld [vmem:[#allocation8 + $0x1a4] sm:$0xf] }
  0xbf   :  { %v466_v3 = vmul.f32 0.2, %v384_v46  ;;  %vm434_vm4 = vcmp.gt.f32.partialorder %v384_v46, 0.0  ;;  %v467_v8 = vmul.f32 0.2, %v413_v50  ;;  %vm435_vm5 = vcmp.gt.f32.partialorder %v413_v50, 0.0  ;;  %1140 = vmatpush.bf16.msra.mxu3 %v1626_v33 }
  0xc0   :  { %vm436_vm2 = vcmp.gt.f32.partialorder %v328_v42, 0.0  ;;  %v468_v45 = vmul.f32 0.2, %v328_v42  ;;  %vm437_vm3 = vcmp.gt.f32.partialorder %v357_v44, 0.0  ;;  %v469_v47 = vmul.f32 0.2, %v357_v44  ;;  %1082 = vmatpush.bf16.msra.mxu1 %v1498_v39  ;;  %1054 = vmatpush.bf16.msra.mxu0 %v1426_v60 }
  0xc1   :  { %v498_v14 = vsel %vm434_vm4, %v384_v46, %v466_v3  ;;  %v499_v21 = vsel %vm435_vm5, %v413_v50, %v467_v8  ;;  %v1618_v3 = vor.u32 %v1741_v61, %v1615_v62  ;;  %v1418_v33 = vor.u32 %v1691_v29, %v1415_v30 }
  0xc2   :  { %v500_v52 = vsel %vm436_vm2, %v328_v42, %v468_v45  ;;  %v501_v57 = vsel %vm437_vm3, %v357_v44, %v469_v47 }
  0xc3   :  { %v1960_v56 = vpack.c.bf16 %v500_v52, %v496_v51  ;;  %v1962_v0 = vpack.c.bf16 %v501_v57, %v497_v48  ;;  %1141 = vmatpush.bf16.msra.mxu3 %v1618_v3  ;;  %v1471_v3 = vld [vmem:[#allocation8 + $0x98] sm:$0xf0] }
  0xc4   :  { %v385_v63 = vpop.f32.mrf.mxu2  ;;  %v414_v5 = vpop.f32.mrf.mxu3  ;;  %1055 = vmatpush.bf16.msra.mxu0 %v1418_v33 }
  0xc5   :  { %v386_v4 = vadd.f32 %v385_v63, %v1952_v37  ;;  %v330_v6 = vpop.f32.mrf.mxu0  ;;  %942 = vmatmul.bf16.vlgmr.msrb.gmra.mxu0 %v1960_v56  ;;  %v415_v9 = vadd.f32 %v414_v5, %v1954_v41  ;;  %v359_v10 = vpop.f32.mrf.mxu1  ;;  %971 = vmatmul.bf16.vlgmr.msrb.gmra.mxu1 %v1962_v0  ;;  %v1709_v63 = vld [vmem:[#allocation8 + $0xb4] sm:$0xf] }
  0xc6   :  { %v360_v13 = vadd.f32 %v359_v10, %v1946_v18  ;;  %v331_v17 = vadd.f32 %v330_v6, %v1948_v19 }
  0xc7   :  { %vm438_vm6 = vcmp.gt.f32.partialorder %v386_v4, 0.0  ;;  %v470_v11 = vmul.f32 0.2, %v386_v4  ;;  %vm439_vm7 = vcmp.gt.f32.partialorder %v415_v9, 0.0  ;;  %v471_v12 = vmul.f32 0.2, %v415_v9 }
  0xc8   :  { %v473_v35 = vmul.f32 0.2, %v360_v13  ;;  %v472_v40 = vmul.f32 0.2, %v331_v17  ;;  %vm441_vm8 = vcmp.gt.f32.partialorder %v360_v13, 0.0  ;;  %vm440_vm9 = vcmp.gt.f32.partialorder %v331_v17, 0.0 }
  0xc9   :  { %v502_v15 = vsel %vm438_vm6, %v386_v4, %v470_v11  ;;  %v503_v22 = vsel %vm439_vm7, %v415_v9, %v471_v12  ;;  %v1487_v4 = vld [vmem:[#allocation8 + $0xb8] sm:$0xf0] }
  0xca   :  { %v1970_v20 = vpack.c.bf16 %v502_v15, %v498_v14  ;;  %v1972_v26 = vpack.c.bf16 %v503_v22, %v499_v21  ;;  %v505_v48 = vsel %vm441_vm8, %v360_v13, %v473_v35  ;;  %v504_v51 = vsel %vm440_vm9, %v331_v17, %v472_v40  ;;  %v1607_v35 = vld [vmem:[#allocation8 + $0x1a8] sm:$0xf0] }
  0xcb   :  { %v1490_v9 = vor.u32 %v1709_v63, %v1487_v4  ;;  %v1610_v40 = vor.u32 %v1739_v34, %v1607_v35  ;;  %v1735_v34 = vld [vmem:[#allocation8 + $0x184] sm:$0xf]  ;;  %v1591_v35 = vld [vmem:[#allocation8 + $0x188] sm:$0xf0] }
  0xcc   :  { %v388_v32 = vpop.f32.mrf.mxu2  ;;  %1000 = vmatmul.bf16.vlgmr.msrb.gmra.mxu2 %v1970_v20  ;;  %v417_v36 = vpop.f32.mrf.mxu3  ;;  %1029 = vmatmul.bf16.vlgmr.msrb.gmra.mxu3 %v1972_v26 }
  0xcd   :  { %v332_v38 = vpop.f32.mrf.mxu0  ;;  %v361_v43 = vpop.f32.mrf.mxu1  ;;  %v389_v46 = vadd.f32 %v388_v32, %v1952_v37  ;;  %v418_v50 = vadd.f32 %v417_v36, %v1954_v41  ;;  %1083 = vmatpush.bf16.msra.mxu1 %v1490_v9  ;;  %v1546_v32 = vor.u32 %v1723_v23, %v1543_v28  ;;  %v1707_v36 = vld [vmem:[#allocation8 + $0xa4] sm:$0xf]  ;;  %1142 = vmatpush.bf16.msra.mxu3 %v1610_v40  ;;  %v1399_v9 = vld [vmem:[#allocation8 + $0x8] sm:$0xf0] }
  0xce   :  { %v333_v42 = vadd.f32 %v332_v38, %v1948_v19  ;;  %v362_v44 = vadd.f32 %v361_v43, %v1946_v18 }
  0xcf   :  { %v474_v5 = vmul.f32 0.2, %v389_v46  ;;  %v475_v10 = vmul.f32 0.2, %v418_v50  ;;  %vm442_vm12 = vcmp.gt.f32.partialorder %v389_v46, 0.0  ;;  %vm443_vm14 = vcmp.gt.f32.partialorder %v418_v50, 0.0  ;;  %1113 = vmatpush.bf16.msra.mxu2 %v1546_v32 }
  0xd0   :  { %v476_v45 = vmul.f32 0.2, %v333_v42  ;;  %vm444_vm10 = vcmp.gt.f32.partialorder %v333_v42, 0.0  ;;  %v477_v47 = vmul.f32 0.2, %v362_v44  ;;  %vm445_vm11 = vcmp.gt.f32.partialorder %v362_v44, 0.0 }
  0xd1   :  { %v506_v21 = vsel %vm442_vm12, %v389_v46, %v474_v5  ;;  %v507_v25 = vsel %vm443_vm14, %v418_v50, %v475_v10  ;;  %v1721_v46 = vld [vmem:[#allocation8 + $0x114] sm:$0xf]  ;;  %v1703_v10 = vld [vmem:[#allocation8 + $0x84] sm:$0xf] }
  0xd2   :  { %v508_v52 = vsel %vm444_vm10, %v333_v42, %v476_v45  ;;  %v509_v58 = vsel %vm445_vm11, %v362_v44, %v477_v47  ;;  %v1479_v42 = vld [vmem:[#allocation8 + $0xa8] sm:$0xf0]  ;;  %v1535_v47 = vld [vmem:[#allocation8 + $0x118] sm:$0xf0] }
  0xd3   :  { %v1980_v57 = vpack.c.bf16 %v508_v52, %v504_v51  ;;  %v1982_v2 = vpack.c.bf16 %v509_v58, %v505_v48  ;;  %v1482_v45 = vor.u32 %v1707_v36, %v1479_v42  ;;  %v1689_v48 = vld [vmem:[#allocation8 + $0x14] sm:$0xf]  ;;  %v1538_v51 = vor.u32 %v1721_v46, %v1535_v47  ;;  %v1407_v52 = vld [vmem:[#allocation8 + $0x18] sm:$0xf0] }
  0xd4   :  { %v390_v1 = vpop.f32.mrf.mxu2  ;;  %v419_v7 = vpop.f32.mrf.mxu3  ;;  %v1410_v58 = vor.u32 %v1689_v48, %v1407_v52 }
  0xd5   :  { %v391_v6 = vadd.f32 %v390_v1, %v1952_v37  ;;  %v335_v8 = vpop.f32.mrf.mxu0  ;;  %947 = vmatmul.bf16.gmra.mxu0 %v1980_v57  ;;  %v420_v11 = vadd.f32 %v419_v7, %v1954_v41  ;;  %v364_v13 = vpop.f32.mrf.mxu1  ;;  %976 = vmatmul.bf16.gmra.mxu1 %v1982_v2  ;;  %v1602_v1 = vor.u32 %v1737_v53, %v1599_v54 }
  0xd6   :  { %v1988_v12 = vadd.f32 %v335_v8, %v1948_v19  ;;  %v365_v16 = vadd.f32 %v364_v13, %v1946_v18  ;;  %1084 = vmatpush.bf16.msra.mxu1 %v1482_v45  ;;  %1114 = vmatpush.bf16.msra.mxu2 %v1538_v51  ;;  %v1474_v7 = vor.u32 %v1705_v59, %v1471_v3  ;;  %v1687_v8 = vld [vmem:[#allocation8 + $0x4] sm:$0xf] }
  0xd7   :  { %v478_v14 = vmul.f32 0.2, %v391_v6  ;;  %vm446_vm13 = vcmp.gt.f32.partialorder %v391_v6, 0.0  ;;  %v479_v15 = vmul.f32 0.2, %v420_v11  ;;  %vm447_vm15 = vcmp.gt.f32.partialorder %v420_v11, 0.0  ;;  %1056 = vmatpush.bf16.msra.mxu0 %v1410_v58  ;;  %1143 = vmatpush.bf16.msra.mxu3 %v1602_v1 }
  0xd8   :  { %v480_v17 = vmul.f32 0.2, %v1988_v12  ;;  %v481_v38 = vmul.f32 0.2, %v365_v16  ;;  %vm449_vm0 = vcmp.gt.f32.partialorder %v365_v16, 0.0  ;;  %vm448_vm1 = vcmp.gt.f32.partialorder %v1988_v12, 0.0 }
  0xd9   :  { %v510_v22 = vsel %vm446_vm13, %v391_v6, %v478_v14  ;;  %v511_v27 = vsel %vm447_vm15, %v420_v11, %v479_v15  ;;  %v1402_v14 = vor.u32 %v1687_v8, %v1399_v9  ;;  %v1463_v15 = vld [vmem:[#allocation8 + $0x88] sm:$0xf0] }
  0xda   :  { %v1993_v24 = vpack.c.bf16 %v510_v22, %v506_v21  ;;  %v1995_v31 = vpack.c.bf16 %v511_v27, %v507_v25  ;;  %v513_v61 = vsel %vm449_vm0, %v365_v16, %v481_v38  ;;  %v512_v5 = vsel %vm448_vm1, %v1988_v12, %v480_v17  ;;  %v1719_v16 = vld [vmem:[#allocation8 + $0x104] sm:$0xf]  ;;  %v1527_v21 = vld [vmem:[#allocation8 + $0x108] sm:$0xf0]  ;;  %1085 = vmatpush.bf16.msra.mxu1 %v1474_v7 }
  0xdb   :  { %v1466_v25 = vor.u32 %v1703_v10, %v1463_v15  ;;  %v1530_v12 = vor.u32 %v1719_v16, %v1527_v21  ;;  %1057 = vmatpush.bf16.msra.mxu0 %v1402_v14  ;;  %v1594_v38 = vor.u32 %v1735_v34, %v1591_v35 }
  0xdc   :  { %v393_v39 = vpop.f32.mrf.mxu2  ;;  %1005 = vmatmul.bf16.gmra.mxu2 %v1993_v24  ;;  %v422_v43 = vpop.f32.mrf.mxu3  ;;  %1034 = vmatmul.bf16.gmra.mxu3 %v1995_v31 }
  0xdd   :  { %v337_v44 = vpop.f32.mrf.mxu0  ;;  %v366_v50 = vpop.f32.mrf.mxu1  ;;  %v394_v62 = vadd.f32 %v393_v39, %v1952_v37  ;;  %v423_v4 = vadd.f32 %v422_v43, %v1954_v41  ;;  %1115 = vmatpush.bf16.msra.mxu2 %v1530_v12  ;;  %1144 = vmatpush.bf16.msra.mxu3 %v1594_v38 }
  0xde   :  { %v338_v49 = vadd.f32 %v337_v44, %v1948_v19  ;;  %v367_v55 = vadd.f32 %v366_v50, %v1946_v18  ;;  %1086 = vmatpush.bf16.msra.mxu1 %v1466_v25 }
  0xdf   :  { %v482_v17 = vmul.f32 0.2, %v394_v62  ;;  %vm450_vm4 = vcmp.gt.f32.partialorder %v394_v62, 0.0  ;;  %v483_v30 = vmul.f32 0.2, %v423_v4  ;;  %vm451_vm6 = vcmp.gt.f32.partialorder %v423_v4, 0.0 }
  0xe0   :  { %v484_v60 = vmul.f32 0.2, %v338_v49  ;;  %vm452_vm2 = vcmp.gt.f32.partialorder %v338_v49, 0.0  ;;  %v485_v63 = vmul.f32 0.2, %v367_v55  ;;  %vm453_vm3 = vcmp.gt.f32.partialorder %v367_v55, 0.0 }
  0xe1   :  { %v514_v42 = vsel %vm450_vm4, %v394_v62, %v482_v17  ;;  %v515_v46 = vsel %vm451_vm6, %v423_v4, %v483_v30 }
  0xe2   :  { %v516_v6 = vsel %vm452_vm2, %v338_v49, %v484_v60  ;;  %v517_v13 = vsel %vm453_vm3, %v367_v55, %v485_v63 }
  0xe3   :  { %v2006_v11 = vpack.c.bf16 %v516_v6, %v512_v5  ;;  %v2008_v23 = vpack.c.bf16 %v517_v13, %v513_v61 }
  0xe4   :  { %v395_v22 = vpop.f32.mrf.mxu2  ;;  %v424_v28 = vpop.f32.mrf.mxu3 }
  0xe5   :  { %v396_v27 = vadd.f32 %v395_v22, %v1952_v37  ;;  %v340_v29 = vpop.f32.mrf.mxu0  ;;  %952 = vmatmul.bf16.gmra.mxu0 %v2006_v11  ;;  %v425_v32 = vadd.f32 %v424_v28, %v1954_v41  ;;  %v369_v33 = vpop.f32.mrf.mxu1  ;;  %981 = vmatmul.bf16.gmra.mxu1 %v2008_v23 }
  0xe6   :  { %v370_v40 = vadd.f32 %v369_v33, %v1946_v18  ;;  %v341_v44 = vadd.f32 %v340_v29, %v1948_v19 }
  0xe7   :  { %v486_v36 = vmul.f32 0.2, %v396_v27  ;;  %vm454_vm5 = vcmp.gt.f32.partialorder %v396_v27, 0.0  ;;  %v487_v39 = vmul.f32 0.2, %v425_v32  ;;  %vm455_vm7 = vcmp.gt.f32.partialorder %v425_v32, 0.0 }
  0xe8   :  { %v489_v50 = vmul.f32 0.2, %v370_v40  ;;  %v488_v53 = vmul.f32 0.2, %v341_v44  ;;  %vm457_vm8 = vcmp.gt.f32.partialorder %v370_v40, 0.0  ;;  %vm456_vm9 = vcmp.gt.f32.partialorder %v341_v44, 0.0 }
  0xe9   :  { %v518_v43 = vsel %vm454_vm5, %v396_v27, %v486_v36  ;;  %v519_v47 = vsel %vm455_vm7, %v425_v32, %v487_v39 }
  0xea   :  { %v538_v45 = vpack.c.bf16 %v518_v43, %v514_v42  ;;  %v539_v48 = vpack.c.bf16 %v519_v47, %v515_v46  ;;  %v521_v62 = vsel %vm457_vm8, %v370_v40, %v489_v50  ;;  %v520_v1 = vsel %vm456_vm9, %v341_v44, %v488_v53 }
  0xec   :  { %v398_v49 = vpop.f32.mrf.mxu2  ;;  %1010 = vmatmul.bf16.gmra.mxu2 %v538_v45  ;;  %v427_v51 = vpop.f32.mrf.mxu3  ;;  %1039 = vmatmul.bf16.gmra.mxu3 %v539_v48 }
  0xed   :  { %v342_v52 = vpop.f32.mrf.mxu0  ;;  %v371_v55 = vpop.f32.mrf.mxu1  ;;  %v399_v60 = vadd.f32 %v398_v49, %v1952_v37  ;;  %v428_v63 = vadd.f32 %v427_v51, %v1954_v41 }
  0xee   :  { %v343_v54 = vadd.f32 %v342_v52, %v1948_v19  ;;  %v372_v58 = vadd.f32 %v371_v55, %v1946_v18 }
  0xef   :  { %v490_v7 = vmul.f32 0.2, %v399_v60  ;;  %v491_v9 = vmul.f32 0.2, %v428_v63  ;;  %vm458_vm12 = vcmp.gt.f32.partialorder %v399_v60, 0.0  ;;  %vm459_vm14 = vcmp.gt.f32.partialorder %v428_v63, 0.0 }
  0xf0   :  { %v492_v59 = vmul.f32 0.2, %v343_v54  ;;  %vm460_vm10 = vcmp.gt.f32.partialorder %v343_v54, 0.0  ;;  %v493_v61 = vmul.f32 0.2, %v372_v58  ;;  %vm461_vm11 = vcmp.gt.f32.partialorder %v372_v58, 0.0 }
  0xf1   :  { %v522_v15 = vsel %vm458_vm12, %v399_v60, %v490_v7  ;;  %v523_v22 = vsel %vm459_vm14, %v428_v63, %v491_v9 }
  0xf2   :  { %v524_v3 = vsel %vm460_vm10, %v343_v54, %v492_v59  ;;  %v525_v5 = vsel %vm461_vm11, %v372_v58, %v493_v61 }
  0xf3   :  { %v540_v4 = vpack.c.bf16 %v524_v3, %v520_v1  ;;  %v541_v19 = vpack.c.bf16 %v525_v5, %v521_v62 }
  0xf4   :  { %v400_v6 = vpop.f32.mrf.mxu2  ;;  %v429_v18 = vpop.f32.mrf.mxu3 }
  0xf5   :  { %v401_v8 = vadd.f32 %v400_v6, %v1952_v37  ;;  %957 = vmatmul.bf16.gmra.mxu0 %v540_v4  ;;  %v430_v10 = vadd.f32 %v429_v18, %v1954_v41  ;;  %986 = vmatmul.bf16.gmra.mxu1 %v541_v19  ;;  %v2036_v41 = vld [vmem:[%s2070_s4] sm:$0x3]  ;;  %s1900_s4 = smov [#allocation10]  }
  0xf6   :  { %s1234_s17 = sshll.u32 %s1900_s4, 4  ;;  %s1235_s17 = int_to_ptr.vmem [resolvable:$true] %s1234_s17 }
  0xf7   :  { %v494_v13 = vmul.f32 0.2, %v401_v8  ;;  %vm462_vm13 = vcmp.gt.f32.partialorder %v401_v8, 0.0  ;;  %v495_v14 = vmul.f32 0.2, %v430_v10  ;;  %vm463_vm15 = vcmp.gt.f32.partialorder %v430_v10, 0.0 }
  0xf9   :  { %v526_v16 = vsel %vm462_vm13, %v401_v8, %v494_v13  ;;  %v527_v25 = vsel %vm463_vm15, %v430_v10, %v495_v14 }
  0xfa   :  { %v542_v21 = vpack.c.bf16 %v526_v16, %v522_v15  ;;  %v543_v12 = vpack.c.bf16 %v527_v25, %v523_v22 }
  0xfc   :  { %1015 = vmatmul.bf16.gmra.mxu2 %v542_v21  ;;  %1044 = vmatmul.bf16.gmra.mxu3 %v543_v12 }
 0x105   :  { %1058 = vmatmul.bf16.vlgmr.msra.gmra.mxu0 %v1960_v56  ;;  %1087 = vmatmul.bf16.vlgmr.msra.gmra.mxu1 %v1962_v0  ;;  %v2039_v0 = vperm.slane %v2036_v41, 0 }
 0x10c   :  { %1116 = vmatmul.bf16.vlgmr.msra.gmra.mxu2 %v1970_v20  ;;  %1145 = vmatmul.bf16.vlgmr.msra.gmra.mxu3 %v1972_v26 }
 0x115   :  { %1063 = vmatmul.bf16.gmra.mxu0 %v1980_v57  ;;  %1092 = vmatmul.bf16.gmra.mxu1 %v1982_v2 }
 0x11c   :  { %1121 = vmatmul.bf16.gmra.mxu2 %v1993_v24  ;;  %1150 = vmatmul.bf16.gmra.mxu3 %v1995_v31 }
 0x125   :  { %1068 = vmatmul.bf16.gmra.mxu0 %v2006_v11  ;;  %1097 = vmatmul.bf16.gmra.mxu1 %v2008_v23 }
 0x12c   :  { %1126 = vmatmul.bf16.gmra.mxu2 %v538_v45  ;;  %1155 = vmatmul.bf16.gmra.mxu3 %v539_v48 }
 0x135   :  { %1073 = vmatmul.bf16.gmra.mxu0 %v540_v4  ;;  %1102 = vmatmul.bf16.gmra.mxu1 %v541_v19 }
 0x13c   :  { %1131 = vmatmul.bf16.gmra.mxu2 %v542_v21  ;;  %1160 = vmatmul.bf16.gmra.mxu3 %v543_v12 }
 0x142   :  { %v943_v37 = vpop.f32.mrf.mxu0  ;;  %v972_v56 = vpop.f32.mrf.mxu1 }
 0x143   :  { %v944_v20 = vadd.f32 %v943_v37, %v2039_v0 }
 0x145   :  { %v973_v2 = vadd.f32 %v972_v56, %v944_v20 }
 0x14a   :  { %v945_v26 = vpop.f32.mrf.mxu0  ;;  %v974_v57 = vpop.f32.mrf.mxu1 }
 0x14b   :  { %v946_v23 = vadd.f32 %v945_v26, %v2039_v0 }
 0x14d   :  { %v975_v30 = vadd.f32 %v974_v57, %v946_v23 }
 0x14f   :  { %v1001_v24 = vpop.f32.mrf.mxu2  ;;  %v1030_v11 = vpop.f32.mrf.mxu3 }
 0x150   :  { %v1002_v31 = vadd.f32 %v1001_v24, %v973_v2 }
 0x152   :  { %v1031_v17 = vadd.f32 %v1030_v11, %v1002_v31  ;;  %v948_v27 = vpop.f32.mrf.mxu0  ;;  %v977_v28 = vpop.f32.mrf.mxu1 }
 0x153   :  { %v949_v36 = vadd.f32 %v948_v27, %v2039_v0 }
 0x154   :  { %vm1166_vm0 = vcmp.gt.f32.partialorder %v1031_v17, 0.0  ;;  %v1182_v29 = vmul.f32 0.2, %v1031_v17 }
 0x155   :  { %v978_v43 = vadd.f32 %v977_v28, %v949_v36 }
 0x156   :  { %v1198_v32 = vsel %vm1166_vm0, %v1031_v17, %v1182_v29 }
 0x157   :  { %1214 = vst [vmem:[#allocation10] sm:$0xff] %v1198_v32  ;;  %v1003_v33 = vpop.f32.mrf.mxu2  ;;  %v1032_v35 = vpop.f32.mrf.mxu3 }
 0x158   :  { %v1004_v34 = vadd.f32 %v1003_v33, %v975_v30  ;;  %v2050_v30 = vperm.slane %v2036_v41, 1 }
 0x15a   :  { %v1033_v38 = vadd.f32 %v1032_v35, %v1004_v34  ;;  %v950_v39 = vpop.f32.mrf.mxu0  ;;  %v979_v40 = vpop.f32.mrf.mxu1 }
 0x15b   :  { %v951_v48 = vadd.f32 %v950_v39, %v2039_v0 }
 0x15c   :  { %vm1168_vm1 = vcmp.gt.f32.partialorder %v1033_v38, 0.0  ;;  %v1184_v42 = vmul.f32 0.2, %v1033_v38 }
 0x15d   :  { %v980_v53 = vadd.f32 %v979_v40, %v951_v48 }
 0x15e   :  { %v1200_v44 = vsel %vm1168_vm1, %v1033_v38, %v1184_v42 }
 0x15f   :  { %1216 = vst [vmem:[#allocation10 + $0x10] sm:$0xff] %v1200_v44  ;;  %v1006_v45 = vpop.f32.mrf.mxu2  ;;  %v1035_v47 = vpop.f32.mrf.mxu3 }
 0x160   :  { %v1007_v46 = vadd.f32 %v1006_v45, %v978_v43 }
 0x162   :  { %v1036_v49 = vadd.f32 %v1035_v47, %v1007_v46  ;;  %v953_v50 = vpop.f32.mrf.mxu0  ;;  %v982_v51 = vpop.f32.mrf.mxu1 }
 0x163   :  { %v954_v60 = vadd.f32 %v953_v50, %v2039_v0 }
 0x164   :  { %vm1170_vm2 = vcmp.gt.f32.partialorder %v1036_v49, 0.0  ;;  %v1186_v52 = vmul.f32 0.2, %v1036_v49 }
 0x165   :  { %v983_v3 = vadd.f32 %v982_v51, %v954_v60 }
 0x166   :  { %v1202_v54 = vsel %vm1170_vm2, %v1036_v49, %v1186_v52 }
 0x167   :  { %1218 = vst [vmem:[#allocation10 + $0x20] sm:$0xff] %v1202_v54  ;;  %v1008_v55 = vpop.f32.mrf.mxu2  ;;  %v1037_v59 = vpop.f32.mrf.mxu3 }
 0x168   :  { %v1009_v58 = vadd.f32 %v1008_v55, %v980_v53 }
 0x16a   :  { %v1038_v61 = vadd.f32 %v1037_v59, %v1009_v58  ;;  %v955_v62 = vpop.f32.mrf.mxu0  ;;  %v984_v63 = vpop.f32.mrf.mxu1 }
 0x16b   :  { %v956_v7 = vadd.f32 %v955_v62, %v2039_v0 }
 0x16c   :  { %vm1172_vm3 = vcmp.gt.f32.partialorder %v1038_v61, 0.0  ;;  %v1188_v1 = vmul.f32 0.2, %v1038_v61 }
 0x16d   :  { %v985_v13 = vadd.f32 %v984_v63, %v956_v7 }
 0x16e   :  { %v1204_v4 = vsel %vm1172_vm3, %v1038_v61, %v1188_v1 }
 0x16f   :  { %1220 = vst [vmem:[#allocation10 + $0x30] sm:$0xff] %v1204_v4  ;;  %v1011_v5 = vpop.f32.mrf.mxu2  ;;  %v1040_v19 = vpop.f32.mrf.mxu3 }
 0x170   :  { %v1012_v6 = vadd.f32 %v1011_v5, %v983_v3 }
 0x172   :  { %v1041_v8 = vadd.f32 %v1040_v19, %v1012_v6  ;;  %v958_v18 = vpop.f32.mrf.mxu0  ;;  %v987_v9 = vpop.f32.mrf.mxu1 }
 0x173   :  { %v959_v22 = vadd.f32 %v958_v18, %v2039_v0 }
 0x174   :  { %vm1174_vm4 = vcmp.gt.f32.partialorder %v1041_v8, 0.0  ;;  %v1190_v10 = vmul.f32 0.2, %v1041_v8 }
 0x175   :  { %v988_v20 = vadd.f32 %v987_v9, %v959_v22 }
 0x176   :  { %v1206_v14 = vsel %vm1174_vm4, %v1041_v8, %v1190_v10 }
 0x177   :  { %1222 = vst [vmem:[#allocation10 + $0x40] sm:$0xff] %v1206_v14  ;;  %v1013_v15 = vpop.f32.mrf.mxu2  ;;  %v1042_v21 = vpop.f32.mrf.mxu3 }
 0x178   :  { %v1014_v16 = vadd.f32 %v1013_v15, %v985_v13 }
 0x17a   :  { %v1043_v25 = vadd.f32 %v1042_v21, %v1014_v16  ;;  %v960_v12 = vpop.f32.mrf.mxu0  ;;  %v989_v37 = vpop.f32.mrf.mxu1 }
 0x17b   :  { %v961_v31 = vadd.f32 %v960_v12, %v2039_v0 }
 0x17c   :  { %vm1176_vm5 = vcmp.gt.f32.partialorder %v1043_v25, 0.0  ;;  %v1192_v56 = vmul.f32 0.2, %v1043_v25 }
 0x17d   :  { %v990_v28 = vadd.f32 %v989_v37, %v961_v31 }
 0x17e   :  { %v1208_v26 = vsel %vm1176_vm5, %v1043_v25, %v1192_v56 }
 0x17f   :  { %1224 = vst [vmem:[#allocation10 + $0x50] sm:$0xff] %v1208_v26  ;;  %v1016_v57 = vpop.f32.mrf.mxu2  ;;  %v1045_v24 = vpop.f32.mrf.mxu3 }
 0x180   :  { %v1017_v2 = vadd.f32 %v1016_v57, %v988_v20 }
 0x182   :  { %v1046_v11 = vadd.f32 %v1045_v24, %v1017_v2  ;;  %v1059_v23 = vpop.f32.mrf.mxu0  ;;  %v1088_v17 = vpop.f32.mrf.mxu1 }
 0x183   :  { %v1060_v35 = vadd.f32 %v1059_v23, %v2050_v30 }
 0x184   :  { %vm1178_vm6 = vcmp.gt.f32.partialorder %v1046_v11, 0.0  ;;  %v1194_v27 = vmul.f32 0.2, %v1046_v11 }
 0x185   :  { %v1089_v40 = vadd.f32 %v1088_v17, %v1060_v35 }
 0x186   :  { %v1210_v29 = vsel %vm1178_vm6, %v1046_v11, %v1194_v27 }
 0x187   :  { %1226 = vst [vmem:[#allocation10 + $0x60] sm:$0xff] %v1210_v29  ;;  %v1018_v32 = vpop.f32.mrf.mxu2  ;;  %v1047_v34 = vpop.f32.mrf.mxu3 }
 0x188   :  { %v1019_v33 = vadd.f32 %v1018_v32, %v990_v28 }
 0x18a   :  { %v1048_v36 = vadd.f32 %v1047_v34, %v1019_v33  ;;  %v1061_v38 = vpop.f32.mrf.mxu0  ;;  %v1090_v39 = vpop.f32.mrf.mxu1 }
 0x18b   :  { %v1062_v41 = vadd.f32 %v1061_v38, %v2050_v30 }
 0x18c   :  { %vm1180_vm7 = vcmp.gt.f32.partialorder %v1048_v36, 0.0  ;;  %v1196_v0 = vmul.f32 0.2, %v1048_v36 }
 0x18d   :  { %v1091_v50 = vadd.f32 %v1090_v39, %v1062_v41 }
 0x18e   :  { %v1212_v42 = vsel %vm1180_vm7, %v1048_v36, %v1196_v0 }
 0x18f   :  { %1228 = vst [vmem:[#allocation10 + $0x70] sm:$0xff] %v1212_v42  ;;  %v1117_v43 = vpop.f32.mrf.mxu2  ;;  %v1146_v45 = vpop.f32.mrf.mxu3 }
 0x190   :  { %v1118_v44 = vadd.f32 %v1117_v43, %v1089_v40 }
 0x192   :  { %v1147_v46 = vadd.f32 %v1146_v45, %v1118_v44  ;;  %v1064_v47 = vpop.f32.mrf.mxu0  ;;  %v1093_v48 = vpop.f32.mrf.mxu1 }
 0x193   :  { %v1065_v55 = vadd.f32 %v1064_v47, %v2050_v30 }
 0x194   :  { %vm1167_vm8 = vcmp.gt.f32.partialorder %v1147_v46, 0.0  ;;  %v1183_v49 = vmul.f32 0.2, %v1147_v46 }
 0x195   :  { %v1094_v62 = vadd.f32 %v1093_v48, %v1065_v55 }
 0x196   :  { %v1199_v51 = vsel %vm1167_vm8, %v1147_v46, %v1183_v49 }
 0x197   :  { %1215 = vst [vmem:[#allocation10 + $0x8] sm:$0xff] %v1199_v51  ;;  %v1119_v52 = vpop.f32.mrf.mxu2  ;;  %v1148_v54 = vpop.f32.mrf.mxu3 }
 0x198   :  { %v1120_v53 = vadd.f32 %v1119_v52, %v1091_v50 }
 0x19a   :  { %v1149_v58 = vadd.f32 %v1148_v54, %v1120_v53  ;;  %v1066_v59 = vpop.f32.mrf.mxu0  ;;  %v1095_v61 = vpop.f32.mrf.mxu1 }
 0x19b   :  { %v1067_v5 = vadd.f32 %v1066_v59, %v2050_v30 }
 0x19c   :  { %vm1169_vm9 = vcmp.gt.f32.partialorder %v1149_v58, 0.0  ;;  %v1185_v60 = vmul.f32 0.2, %v1149_v58 }
 0x19d   :  { %v1096_v8 = vadd.f32 %v1095_v61, %v1067_v5 }
 0x19e   :  { %v1201_v63 = vsel %vm1169_vm9, %v1149_v58, %v1185_v60 }
 0x19f   :  { %1217 = vst [vmem:[#allocation10 + $0x18] sm:$0xff] %v1201_v63  ;;  %v1122_v1 = vpop.f32.mrf.mxu2  ;;  %v1151_v4 = vpop.f32.mrf.mxu3 }
 0x1a0   :  { %v1123_v3 = vadd.f32 %v1122_v1, %v1094_v62 }
 0x1a2   :  { %v1152_v6 = vadd.f32 %v1151_v4, %v1123_v3  ;;  %v1069_v19 = vpop.f32.mrf.mxu0  ;;  %v1098_v9 = vpop.f32.mrf.mxu1 }
 0x1a3   :  { %v1070_v15 = vadd.f32 %v1069_v19, %v2050_v30 }
 0x1a4   :  { %vm1171_vm10 = vcmp.gt.f32.partialorder %v1152_v6, 0.0  ;;  %v1187_v7 = vmul.f32 0.2, %v1152_v6 }
 0x1a5   :  { %v1099_v25 = vadd.f32 %v1098_v9, %v1070_v15 }
 0x1a6   :  { %v1203_v18 = vsel %vm1171_vm10, %v1152_v6, %v1187_v7 }
 0x1a7   :  { %1219 = vst [vmem:[#allocation10 + $0x28] sm:$0xff] %v1203_v18  ;;  %v1124_v10 = vpop.f32.mrf.mxu2  ;;  %v1153_v14 = vpop.f32.mrf.mxu3 }
 0x1a8   :  { %v1125_v13 = vadd.f32 %v1124_v10, %v1096_v8 }
 0x1aa   :  { %v1154_v16 = vadd.f32 %v1153_v14, %v1125_v13  ;;  %v1071_v21 = vpop.f32.mrf.mxu0  ;;  %v1100_v26 = vpop.f32.mrf.mxu1 }
 0x1ab   :  { %v1072_v57 = vadd.f32 %v1071_v21, %v2050_v30 }
 0x1ac   :  { %vm1173_vm11 = vcmp.gt.f32.partialorder %v1154_v16, 0.0  ;;  %v1189_v22 = vmul.f32 0.2, %v1154_v16 }
 0x1ad   :  { %v1101_v11 = vadd.f32 %v1100_v26, %v1072_v57 }
 0x1ae   :  { %v1205_v12 = vsel %vm1173_vm11, %v1154_v16, %v1189_v22 }
 0x1af   :  { %1221 = vst [vmem:[#allocation10 + $0x38] sm:$0xff] %v1205_v12  ;;  %v1127_v37 = vpop.f32.mrf.mxu2  ;;  %v1156_v20 = vpop.f32.mrf.mxu3 }
 0x1b0   :  { %v1128_v56 = vadd.f32 %v1127_v37, %v1099_v25 }
 0x1b2   :  { %v1157_v2 = vadd.f32 %v1156_v20, %v1128_v56  ;;  %v1074_v31 = vpop.f32.mrf.mxu0  ;;  %v1103_v33 = vpop.f32.mrf.mxu1 }
 0x1b3   :  { %v1075_v29 = vadd.f32 %v1074_v31, %v2050_v30 }
 0x1b4   :  { %vm1175_vm12 = vcmp.gt.f32.partialorder %v1157_v2, 0.0  ;;  %v1191_v24 = vmul.f32 0.2, %v1157_v2 }
 0x1b5   :  { %v1104_v35 = vadd.f32 %v1103_v33, %v1075_v29 }
 0x1b6   :  { %v1207_v23 = vsel %vm1175_vm12, %v1157_v2, %v1191_v24 }
 0x1b7   :  { %1223 = vst [vmem:[#allocation10 + $0x48] sm:$0xff] %v1207_v23  ;;  %v1129_v17 = vpop.f32.mrf.mxu2  ;;  %v1158_v28 = vpop.f32.mrf.mxu3 }
 0x1b8   :  { %v1130_v27 = vadd.f32 %v1129_v17, %v1101_v11 }
 0x1ba   :  { %v1159_v32 = vadd.f32 %v1158_v28, %v1130_v27  ;;  %v1076_v38 = vpop.f32.mrf.mxu0  ;;  %v1105_v45 = vpop.f32.mrf.mxu1 }
 0x1bb   :  { %v1077_v42 = vadd.f32 %v1076_v38, %v2050_v30 }
 0x1bc   :  { %vm1177_vm13 = vcmp.gt.f32.partialorder %v1159_v32, 0.0  ;;  %v1193_v34 = vmul.f32 0.2, %v1159_v32 }
 0x1bd   :  { %v1106_v41 = vadd.f32 %v1105_v45, %v1077_v42 }
 0x1be   :  { %v1209_v36 = vsel %vm1177_vm13, %v1159_v32, %v1193_v34 }
 0x1bf   :  { %1225 = vst [vmem:[#allocation10 + $0x58] sm:$0xff] %v1209_v36  ;;  %v1132_v39 = vpop.f32.mrf.mxu2  ;;  %v1161_v40 = vpop.f32.mrf.mxu3 }
 0x1c0   :  { %v1133_v0 = vadd.f32 %v1132_v39, %v1104_v35 }
 0x1c2   :  { %v1162_v43 = vadd.f32 %v1161_v40, %v1133_v0 }
 0x1c4   :  { %vm1179_vm14 = vcmp.gt.f32.partialorder %v1162_v43, 0.0  ;;  %v1195_v44 = vmul.f32 0.2, %v1162_v43 }
 0x1c6   :  { %v1211_v46 = vsel %vm1179_vm14, %v1162_v43, %v1195_v44 }
 0x1c7   :  { %1227 = vst [vmem:[#allocation10 + $0x68] sm:$0xff] %v1211_v46  ;;  %v1134_v47 = vpop.f32.mrf.mxu2  ;;  %v1163_v49 = vpop.f32.mrf.mxu3 }
 0x1c8   :  { %v1135_v48 = vadd.f32 %v1134_v47, %v1106_v41 }
 0x1ca   :  { %v1164_v50 = vadd.f32 %v1163_v49, %v1135_v48 }
 0x1cc   :  { %vm1181_vm15 = vcmp.gt.f32.partialorder %v1164_v50, 0.0  ;;  %v1197_v51 = vmul.f32 0.2, %v1164_v50 }
 0x1ce   :  { %v1213_v30 = vsel %vm1181_vm15, %v1164_v50, %v1197_v51 }
 0x1cf   :  { %1229 = vst [vmem:[#allocation10 + $0x78] sm:$0xff] %v1213_v30 }
 0x1d0   :  { %1242 = dma.vmem_to_hbm [thread:$0]  %s1235_s17, 2048, %s1237_s20, [#allocation4], %s1891_s26, %s1891_s26, %s1892_s27  }
 0x1d1   :  { %1888 = dma.done.wait [#allocation4], 2048  }
 0x1d2   :  { %1889 = vsyncadd [#allocation4], 4294965248 }
 0x1d3   :  { %1247 = vsyncpa [#allocation3], 1 }
 0x1d4   :  { %1248 = vsyncpa [#allocation6], 1 }
 0x1d5   :  { %1249 = vsyncpa [#allocation9], 1 }
 0x1d6   :  { %1250 = vsyncpa [#allocation4], 1 }

// kernel: tpu_custom_call.1
= control target key start
LH: loop header
LB: loop body
LE: loop exit
PB: predicated region body
PF: predicated region fallthrough
CT: control target
= control target key end

     0   :  { %10 = vsyncpa [#allocation3], 0  ;;  %s2066_s0 = inlined_call_operand.hbm [shape: bf16[64,128], index: 0, kind: input, shape index: {}]   ;;  %s2067_s1 = inlined_call_operand.hbm [shape: bf16[128,512], index: 1, kind: input, shape index: {}]   ;;  %s2068_s2 = inlined_call_operand.hbm [shape: f32[1,512], index: 2, kind: input, shape index: {}]   ;;  %s2069_s3 = inlined_call_operand.hbm [shape: bf16[512,256], index: 3, kind: input, shape index: {}]   ;;  %s2070_s4 = inlined_call_operand.vmem [shape: f32[1,256], index: 4, kind: input, shape index: {}]   ;;  %s2071_s5 = inlined_call_operand.hbm [shape: f32[64,256], index: 5, kind: output, shape index: {}]  }
   0x1   :  { %11 = vsyncpa [#allocation6], 0 }
   0x2   :  { %12 = vsyncpa [#allocation9], 0  ;;  %s31_s20 = sshll.u32 %s2067_s1, 4  ;;  %s32_s20 = int_to_ptr.hbm [resolvable:$true] %s31_s20 }
   0x3   :  { %13 = vsyncpa [#allocation4], 0  ;;  %s1890_s21 = smov [#allocation5]   ;;  %s18_s25 = sshll.u32 %s2066_s0, 4  ;;  %s19_s25 = int_to_ptr.hbm [resolvable:$true] %s18_s25 }
   0x4   :  { %s33_s22 = sshll.u32 %s1890_s21, 4  ;;  %s1891_s26 = smov 256   ;;  %s34_s22 = int_to_ptr.vmem [resolvable:$true] %s33_s22 }
   0x5   :  { %s1892_s27 = smov 16   ;;  %s1893_s28 = smov [#allocation2]  }
   0x6   :  { %39 = dma.hbm_to_vmem [thread:$0]  %s32_s20, 4096, %s34_s22, [#allocation6], %s1891_s26, %s1891_s26, %s1892_s27  }
   0x7   :  { %s20_s29 = sshll.u32 %s1893_s28, 4  ;;  %s1894_s1 = smov 64   ;;  %s21_s29 = int_to_ptr.vmem [resolvable:$true] %s20_s29 }
   0x8   :  { %s1895_s30 = smov 4   ;;  %s45_s8 = sshll.u32 %s2068_s2, 4  ;;  %s46_s8 = int_to_ptr.hbm [resolvable:$true] %s45_s8 }
   0x9   :  { %26 = dma.hbm_to_vmem [thread:$0]  %s19_s25, 512, %s21_s29, [#allocation3], %s1894_s1, %s1894_s1, %s1895_s30  }
   0xa   :  { %s1896_s9 = smov [#allocation7]   ;;  %s55_s12 = sshll.u32 %s2069_s3, 4  ;;  %s56_s12 = int_to_ptr.hbm [resolvable:$true] %s55_s12 }
   0xb   :  { %s47_s0 = sshll.u32 %s1896_s9, 4  ;;  %s1897_s13 = smov [#allocation8]   ;;  %s48_s0 = int_to_ptr.vmem [resolvable:$true] %s47_s0 }
   0xc   :  { %50 = dma.hbm_to_vmem [thread:$0]  %s46_s8, 64, %s48_s0, [#allocation6]  }
   0xd   :  { %s57_s14 = sshll.u32 %s1897_s13, 4  ;;  %s1898_s15 = smov 128   ;;  %s58_s14 = int_to_ptr.vmem [resolvable:$true] %s57_s14 }
   0xe   :  { %s1899_s16 = smov 8  }
   0xf   :  { %63 = dma.hbm_to_vmem [thread:$0]  %s56_s12, 8192, %s58_s14, [#allocation9], %s1898_s15, %s1898_s15, %s1899_s16  }
  0x10   :  { %1882 = dma.done.wait [#allocation3], 512  }
  0x11   :  { %1883 = vsyncadd [#allocation3], 4294966784 }
  0x12   :  { %1884 = dma.done.wait [#allocation6], 4160  }
  0x13   :  { %1885 = vsyncadd [#allocation6], 4294963136 }
  0x14   :  { %1886 = dma.done.wait [#allocation9], 8192  }
  0x15   :  { %1887 = vsyncadd [#allocation9], 4294959104  ;;  %v1381_v0 = vld [vmem:[#allocation5 + $0xe0] sm:$0xf]  ;;  %v1685_v1 = vld [vmem:[#allocation5 + $0xec] sm:$0xf0] }
  0x16   :  { %v1683_v2 = vld [vmem:[#allocation5 + $0xe4] sm:$0xf]  ;;  %v1382_v3 = vor.u32 %v1685_v1, %v1381_v0  ;;  %v1383_v4 = vld [vmem:[#allocation5 + $0xf0] sm:$0xf0]  ;;  %v1389_v5 = vld [vmem:[#allocation5 + $0xe8] sm:$0xf] }
  0x17   :  { %v1686_v6 = vld [vmem:[#allocation5 + $0xf4] sm:$0xf0]  ;;  %v1386_v7 = vor.u32 %v1683_v2, %v1383_v4  ;;  %v1684_v9 = vld [vmem:[#allocation5 + $0xec] sm:$0xf]  ;;  %v1391_v10 = vld [vmem:[#allocation5 + $0xf8] sm:$0xf0] }
  0x18   :  { %v1390_v8 = vor.u32 %v1686_v6, %v1389_v5  ;;  %v1365_v11 = vld [vmem:[#allocation5 + $0xc0] sm:$0xf]  ;;  %316 = vmatpush.bf16.msra.mxu0 %v1382_v3  ;;  %v1394_v12 = vor.u32 %v1684_v9, %v1391_v10  ;;  %v1681_v13 = vld [vmem:[#allocation5 + $0xcc] sm:$0xf0]  ;;  %v1679_v14 = vld [vmem:[#allocation5 + $0xc4] sm:$0xf] }
  0x19   :  { %v1367_v15 = vld [vmem:[#allocation5 + $0xd0] sm:$0xf0]  ;;  %345 = vmatpush.bf16.msra.mxu1 %v1386_v7  ;;  %v1366_v16 = vor.u32 %v1681_v13, %v1365_v11  ;;  %v1373_v18 = vld [vmem:[#allocation5 + $0xc8] sm:$0xf]  ;;  %v1682_v19 = vld [vmem:[#allocation5 + $0xd4] sm:$0xf0] }
  0x1a   :  { %374 = vmatpush.bf16.msra.mxu2 %v1390_v8  ;;  %v1370_v17 = vor.u32 %v1679_v14, %v1367_v15  ;;  %v1680_v20 = vld [vmem:[#allocation5 + $0xcc] sm:$0xf]  ;;  %403 = vmatpush.bf16.msra.mxu3 %v1394_v12  ;;  %v1374_v21 = vor.u32 %v1682_v19, %v1373_v18  ;;  %v1375_v22 = vld [vmem:[#allocation5 + $0xd8] sm:$0xf0]  ;;  %v1349_v23 = vld [vmem:[#allocation5 + $0xa0] sm:$0xf] }
  0x1b   :  { %v1677_v24 = vld [vmem:[#allocation5 + $0xac] sm:$0xf0]  ;;  %v1378_v25 = vor.u32 %v1680_v20, %v1375_v22  ;;  %v1675_v26 = vld [vmem:[#allocation5 + $0xa4] sm:$0xf]  ;;  %v1351_v27 = vld [vmem:[#allocation5 + $0xb0] sm:$0xf0] }
  0x1c   :  { %v1357_v28 = vld [vmem:[#allocation5 + $0xa8] sm:$0xf]  ;;  %317 = vmatpush.bf16.msra.mxu0 %v1366_v16  ;;  %v1350_v29 = vor.u32 %v1677_v24, %v1349_v23  ;;  %v1678_v30 = vld [vmem:[#allocation5 + $0xb4] sm:$0xf0]  ;;  %v1676_v31 = vld [vmem:[#allocation5 + $0xac] sm:$0xf]  ;;  %v1354_v33 = vor.u32 %v1675_v26, %v1351_v27 }
  0x1d   :  { %v1359_v32 = vld [vmem:[#allocation5 + $0xb8] sm:$0xf0]  ;;  %346 = vmatpush.bf16.msra.mxu1 %v1370_v17  ;;  %v1358_v34 = vor.u32 %v1678_v30, %v1357_v28  ;;  %v1333_v35 = vld [vmem:[#allocation5 + $0x80] sm:$0xf]  ;;  %v1673_v36 = vld [vmem:[#allocation5 + $0x8c] sm:$0xf0] }
  0x1e   :  { %375 = vmatpush.bf16.msra.mxu2 %v1374_v21  ;;  %v1671_v37 = vld [vmem:[#allocation5 + $0x84] sm:$0xf]  ;;  %404 = vmatpush.bf16.msra.mxu3 %v1378_v25  ;;  %v1362_v38 = vor.u32 %v1676_v31, %v1359_v32  ;;  %v1335_v39 = vld [vmem:[#allocation5 + $0x90] sm:$0xf0]  ;;  %v1341_v40 = vld [vmem:[#allocation5 + $0x88] sm:$0xf]  ;;  %v1334_v44 = vor.u32 %v1673_v36, %v1333_v35 }
  0x1f   :  { %v1674_v41 = vld [vmem:[#allocation5 + $0x94] sm:$0xf0]  ;;  %v1672_v42 = vld [vmem:[#allocation5 + $0x8c] sm:$0xf]  ;;  %v1343_v43 = vld [vmem:[#allocation5 + $0x98] sm:$0xf0]  ;;  %v1338_v45 = vor.u32 %v1671_v37, %v1335_v39 }
  0x20   :  { %318 = vmatpush.bf16.msra.mxu0 %v1350_v29  ;;  %v1342_v46 = vor.u32 %v1674_v41, %v1341_v40  ;;  %v1317_v47 = vld [vmem:[#allocation5 + $0x60] sm:$0xf]  ;;  %v1669_v48 = vld [vmem:[#allocation5 + $0x6c] sm:$0xf0]  ;;  %v1667_v49 = vld [vmem:[#allocation5 + $0x64] sm:$0xf]  ;;  %v1346_v50 = vor.u32 %v1672_v42, %v1343_v43 }
  0x21   :  { %347 = vmatpush.bf16.msra.mxu1 %v1354_v33  ;;  %v1319_v51 = vld [vmem:[#allocation5 + $0x70] sm:$0xf0]  ;;  %v1325_v52 = vld [vmem:[#allocation5 + $0x68] sm:$0xf]  ;;  %v1670_v53 = vld [vmem:[#allocation5 + $0x74] sm:$0xf0]  ;;  %v1318_v56 = vor.u32 %v1669_v48, %v1317_v47 }
  0x22   :  { %376 = vmatpush.bf16.msra.mxu2 %v1358_v34  ;;  %405 = vmatpush.bf16.msra.mxu3 %v1362_v38  ;;  %v1668_v54 = vld [vmem:[#allocation5 + $0x6c] sm:$0xf]  ;;  %v1327_v55 = vld [vmem:[#allocation5 + $0x78] sm:$0xf0]  ;;  %v1322_v57 = vor.u32 %v1667_v49, %v1319_v51  ;;  %v1326_v58 = vor.u32 %v1670_v53, %v1325_v52  ;;  %v1301_v59 = vld [vmem:[#allocation5 + $0x40] sm:$0xf] }
  0x23   :  { %v1665_v60 = vld [vmem:[#allocation5 + $0x4c] sm:$0xf0]  ;;  %v1663_v61 = vld [vmem:[#allocation5 + $0x44] sm:$0xf]  ;;  %v1330_v62 = vor.u32 %v1668_v54, %v1327_v55  ;;  %v1303_v63 = vld [vmem:[#allocation5 + $0x50] sm:$0xf0] }
  0x24   :  { %319 = vmatpush.bf16.msra.mxu0 %v1334_v44  ;;  %v1309_v0 = vld [vmem:[#allocation5 + $0x48] sm:$0xf]  ;;  %v1666_v1 = vld [vmem:[#allocation5 + $0x54] sm:$0xf0]  ;;  %v1664_v2 = vld [vmem:[#allocation5 + $0x4c] sm:$0xf]  ;;  %v1302_v4 = vor.u32 %v1665_v60, %v1301_v59  ;;  %v1306_v5 = vor.u32 %v1663_v61, %v1303_v63 }
  0x25   :  { %348 = vmatpush.bf16.msra.mxu1 %v1338_v45  ;;  %v1311_v3 = vld [vmem:[#allocation5 + $0x58] sm:$0xf0]  ;;  %v1310_v6 = vor.u32 %v1666_v1, %v1309_v0  ;;  %v1285_v7 = vld [vmem:[#allocation5 + $0x20] sm:$0xf]  ;;  %v1661_v8 = vld [vmem:[#allocation5 + $0x2c] sm:$0xf0] }
  0x26   :  { %377 = vmatpush.bf16.msra.mxu2 %v1342_v46  ;;  %406 = vmatpush.bf16.msra.mxu3 %v1346_v50  ;;  %v1659_v9 = vld [vmem:[#allocation5 + $0x24] sm:$0xf]  ;;  %v1314_v10 = vor.u32 %v1664_v2, %v1311_v3  ;;  %v1287_v11 = vld [vmem:[#allocation5 + $0x30] sm:$0xf0]  ;;  %v1293_v12 = vld [vmem:[#allocation5 + $0x28] sm:$0xf]  ;;  %v1286_v16 = vor.u32 %v1661_v8, %v1285_v7 }
  0x27   :  { %v1662_v13 = vld [vmem:[#allocation5 + $0x34] sm:$0xf0]  ;;  %v1660_v14 = vld [vmem:[#allocation5 + $0x2c] sm:$0xf]  ;;  %v1295_v15 = vld [vmem:[#allocation5 + $0x38] sm:$0xf0]  ;;  %v1290_v17 = vor.u32 %v1659_v9, %v1287_v11 }
  0x28   :  { %320 = vmatpush.bf16.msra.mxu0 %v1318_v56  ;;  %v1294_v18 = vor.u32 %v1662_v13, %v1293_v12  ;;  %v1269_v19 = vld [vmem:[#allocation5] sm:$0xf]  ;;  %v1657_v20 = vld [vmem:[#allocation5 + $0xc] sm:$0xf0]  ;;  %v1655_v21 = vld [vmem:[#allocation5 + $0x4] sm:$0xf]  ;;  %v1298_v22 = vor.u32 %v1660_v14, %v1295_v15 }
  0x29   :  { %349 = vmatpush.bf16.msra.mxu1 %v1322_v57  ;;  %v1271_v23 = vld [vmem:[#allocation5 + $0x10] sm:$0xf0]  ;;  %v1277_v24 = vld [vmem:[#allocation5 + $0x8] sm:$0xf]  ;;  %v1658_v25 = vld [vmem:[#allocation5 + $0x14] sm:$0xf0]  ;;  %v1270_v28 = vor.u32 %v1657_v20, %v1269_v19 }
  0x2a   :  { %378 = vmatpush.bf16.msra.mxu2 %v1326_v58  ;;  %407 = vmatpush.bf16.msra.mxu3 %v1330_v62  ;;  %v1656_v26 = vld [vmem:[#allocation5 + $0xc] sm:$0xf]  ;;  %v1279_v27 = vld [vmem:[#allocation5 + $0x18] sm:$0xf0]  ;;  %v1274_v29 = vor.u32 %v1655_v21, %v1271_v23  ;;  %v1278_v30 = vor.u32 %v1658_v25, %v1277_v24  ;;  %v1651_v32 = vld [vmem:[#allocation2] sm:$0xff]  ;;  %s1236_s20 = sshll.u32 %s2071_s5, 4  ;;  %s1237_s20 = int_to_ptr.hbm [resolvable:$true] %s1236_s20 }
  0x2b   :  { %v1282_v31 = vor.u32 %v1656_v26, %v1279_v27  ;;  %v1652_v33 = vld [vmem:[#allocation2 + $0x8] sm:$0xff]  ;;  %v1581_v34 = vld [vmem:[#allocation8 + $0x170] sm:$0xf]  ;;  %v1734_v35 = vld [vmem:[#allocation8 + $0x174] sm:$0xf0] }
  0x2c   :  { %321 = vmatpush.bf16.msra.mxu0 %v1302_v4  ;;  %v1453_v36 = vld [vmem:[#allocation8 + $0x70] sm:$0xf]  ;;  %v1582_v37 = vor.u32 %v1734_v35, %v1581_v34  ;;  %v1702_v38 = vld [vmem:[#allocation8 + $0x74] sm:$0xf0]  ;;  %v1573_v45 = vld [vmem:[#allocation8 + $0x160] sm:$0xf] }
  0x2d   :  { %350 = vmatpush.bf16.msra.mxu1 %v1306_v5  ;;  %v1645_v39 = vld [vmem:[#allocation8 + $0x1f0] sm:$0xf]  ;;  %v1750_v40 = vld [vmem:[#allocation8 + $0x1f4] sm:$0xf0]  ;;  %v1454_v41 = vor.u32 %v1702_v38, %v1453_v36  ;;  %v1732_v47 = vld [vmem:[#allocation8 + $0x164] sm:$0xf0] }
  0x2e   :  { %379 = vmatpush.bf16.msra.mxu2 %v1310_v6  ;;  %408 = vmatpush.bf16.msra.mxu3 %v1314_v10  ;;  %v1646_v42 = vor.u32 %v1750_v40, %v1645_v39  ;;  %v1517_v43 = vld [vmem:[#allocation8 + $0xf0] sm:$0xf]  ;;  %v1718_v44 = vld [vmem:[#allocation8 + $0xf4] sm:$0xf0]  ;;  %v1445_v48 = vld [vmem:[#allocation8 + $0x60] sm:$0xf]  ;;  %v1574_v50 = vor.u32 %v1732_v47, %v1573_v45 }
  0x2f   :  { %v1518_v46 = vor.u32 %v1718_v44, %v1517_v43  ;;  %v1700_v49 = vld [vmem:[#allocation8 + $0x64] sm:$0xf0]  ;;  %v1637_v52 = vld [vmem:[#allocation8 + $0x1e0] sm:$0xf]  ;;  %v1565_v57 = vld [vmem:[#allocation8 + $0x150] sm:$0xf] }
  0x30   :  { %322 = vmatpush.bf16.msra.mxu0 %v1286_v16  ;;  %v1446_v51 = vor.u32 %v1700_v49, %v1445_v48  ;;  %v1748_v53 = vld [vmem:[#allocation8 + $0x1e4] sm:$0xf0]  ;;  %v1509_v54 = vld [vmem:[#allocation8 + $0xe0] sm:$0xf]  ;;  %v1730_v58 = vld [vmem:[#allocation8 + $0x154] sm:$0xf0] }
  0x31   :  { %351 = vmatpush.bf16.msra.mxu1 %v1290_v17  ;;  %v1638_v55 = vor.u32 %v1748_v53, %v1637_v52  ;;  %v1716_v56 = vld [vmem:[#allocation8 + $0xe4] sm:$0xf0]  ;;  %v1437_v60 = vld [vmem:[#allocation8 + $0x50] sm:$0xf]  ;;  %v1698_v61 = vld [vmem:[#allocation8 + $0x54] sm:$0xf0]  ;;  %v1566_v63 = vor.u32 %v1730_v58, %v1565_v57 }
  0x32   :  { %380 = vmatpush.bf16.msra.mxu2 %v1294_v18  ;;  %409 = vmatpush.bf16.msra.mxu3 %v1298_v22  ;;  %v1510_v59 = vor.u32 %v1716_v56, %v1509_v54  ;;  %v1629_v62 = vld [vmem:[#allocation8 + $0x1d0] sm:$0xf]  ;;  %v1746_v0 = vld [vmem:[#allocation8 + $0x1d4] sm:$0xf0]  ;;  %v1438_v4 = vor.u32 %v1698_v61, %v1437_v60  ;;  %v1557_v7 = vld [vmem:[#allocation8 + $0x140] sm:$0xf] }
  0x33   :  { %v1501_v1 = vld [vmem:[#allocation8 + $0xd0] sm:$0xf]  ;;  %v1714_v2 = vld [vmem:[#allocation8 + $0xd4] sm:$0xf0]  ;;  %v1630_v5 = vor.u32 %v1746_v0, %v1629_v62  ;;  %v1728_v8 = vld [vmem:[#allocation8 + $0x144] sm:$0xf0] }
  0x34   :  { %323 = vmatpush.bf16.msra.mxu0 %v1270_v28  ;;  %v1653_v3 = vld [vmem:[#allocation2 + $0x10] sm:$0xff]  ;;  %v1502_v6 = vor.u32 %v1714_v2, %v1501_v1  ;;  %v1429_v9 = vld [vmem:[#allocation8 + $0x40] sm:$0xf]  ;;  %v1696_v10 = vld [vmem:[#allocation8 + $0x44] sm:$0xf0]  ;;  %v1558_v15 = vor.u32 %v1728_v8, %v1557_v7 }
  0x35   :  { %352 = vmatpush.bf16.msra.mxu1 %v1274_v29  ;;  %v1621_v11 = vld [vmem:[#allocation8 + $0x1c0] sm:$0xf]  ;;  %v1744_v12 = vld [vmem:[#allocation8 + $0x1c4] sm:$0xf0]  ;;  %v1430_v16 = vor.u32 %v1696_v10, %v1429_v9  ;;  %v1549_v18 = vld [vmem:[#allocation8 + $0x130] sm:$0xf] }
  0x36   :  { %381 = vmatpush.bf16.msra.mxu2 %v1278_v30  ;;  %410 = vmatpush.bf16.msra.mxu3 %v1282_v31  ;;  %v1493_v13 = vld [vmem:[#allocation8 + $0xc0] sm:$0xf]  ;;  %v1712_v14 = vld [vmem:[#allocation8 + $0xc4] sm:$0xf0]  ;;  %v1622_v17 = vor.u32 %v1744_v12, %v1621_v11  ;;  %v1726_v19 = vld [vmem:[#allocation8 + $0x134] sm:$0xf0] }
  0x37   :  { %324 = vmatmul.bf16.vlgmr.msra.gmra.mxu0 %v1651_v32  ;;  %v1421_v20 = vld [vmem:[#allocation8 + $0x30] sm:$0xf]  ;;  %v1494_v21 = vor.u32 %v1712_v14, %v1493_v13  ;;  %v1694_v22 = vld [vmem:[#allocation8 + $0x34] sm:$0xf0]  ;;  %v1550_v27 = vor.u32 %v1726_v19, %v1549_v18  ;;  %v1541_v30 = vld [vmem:[#allocation8 + $0x120] sm:$0xf] }
  0x38   :  { %353 = vmatmul.bf16.vlgmr.msra.gmra.mxu1 %v1651_v32  ;;  %934 = vmatpush.bf16.msrb.mxu0 %v1454_v41  ;;  %v1613_v23 = vld [vmem:[#allocation8 + $0x1b0] sm:$0xf]  ;;  %v1742_v24 = vld [vmem:[#allocation8 + $0x1b4] sm:$0xf0]  ;;  %v1422_v28 = vor.u32 %v1694_v22, %v1421_v20  ;;  %v1724_v31 = vld [vmem:[#allocation8 + $0x124] sm:$0xf0] }
  0x39   :  { %382 = vmatmul.bf16.vlgmr.msra.gmra.mxu2 %v1651_v32  ;;  %411 = vmatmul.bf16.vlgmr.msra.gmra.mxu3 %v1651_v32  ;;  %v1485_v25 = vld [vmem:[#allocation8 + $0xb0] sm:$0xf]  ;;  %v1710_v26 = vld [vmem:[#allocation8 + $0xb4] sm:$0xf0]  ;;  %v1614_v29 = vor.u32 %v1742_v24, %v1613_v23  ;;  %v1413_v35 = vld [vmem:[#allocation8 + $0x20] sm:$0xf] }
  0x3a   :  { %992 = vmatpush.bf16.msrb.mxu2 %v1582_v37  ;;  %1021 = vmatpush.bf16.msrb.mxu3 %v1646_v42  ;;  %v1486_v32 = vor.u32 %v1710_v26, %v1485_v25  ;;  %v1654_v34 = vld [vmem:[#allocation2 + $0x18] sm:$0xff]  ;;  %v1692_v36 = vld [vmem:[#allocation8 + $0x24] sm:$0xf0]  ;;  %v1605_v37 = vld [vmem:[#allocation8 + $0x1a0] sm:$0xf] }
  0x3b   :  { %963 = vmatpush.bf16.msrb.mxu1 %v1518_v46  ;;  %v1414_v38 = vor.u32 %v1692_v36, %v1413_v35  ;;  %v1740_v39 = vld [vmem:[#allocation8 + $0x1a4] sm:$0xf0]  ;;  %v1477_v40 = vld [vmem:[#allocation8 + $0xa0] sm:$0xf]  ;;  %v1405_v44 = vld [vmem:[#allocation8 + $0x10] sm:$0xf] }
  0x3c   :  { %935 = vmatpush.bf16.msrb.mxu0 %v1446_v51  ;;  %v1708_v41 = vld [vmem:[#allocation8 + $0xa4] sm:$0xf0]  ;;  %v1606_v42 = vor.u32 %v1740_v39, %v1605_v37  ;;  %v1690_v45 = vld [vmem:[#allocation8 + $0x14] sm:$0xf0]  ;;  %v1469_v46 = vld [vmem:[#allocation8 + $0x90] sm:$0xf] }
  0x3d   :  { %v1478_v43 = vor.u32 %v1708_v41, %v1477_v40  ;;  %v1406_v47 = vor.u32 %v1690_v45, %v1405_v44  ;;  %v1706_v48 = vld [vmem:[#allocation8 + $0x94] sm:$0xf0]  ;;  %v1597_v53 = vld [vmem:[#allocation8 + $0x190] sm:$0xf]  ;;  %v1688_v57 = vld [vmem:[#allocation8 + $0x4] sm:$0xf0] }
  0x3e   :  { %993 = vmatpush.bf16.msrb.mxu2 %v1574_v50  ;;  %1022 = vmatpush.bf16.msrb.mxu3 %v1638_v55  ;;  %v1470_v49 = vor.u32 %v1706_v48, %v1469_v46  ;;  %v1533_v50 = vld [vmem:[#allocation8 + $0x110] sm:$0xf]  ;;  %v1722_v51 = vld [vmem:[#allocation8 + $0x114] sm:$0xf0]  ;;  %v1397_v55 = vld [vmem:[#allocation8] sm:$0xf] }
  0x3f   :  { %964 = vmatpush.bf16.msrb.mxu1 %v1510_v59  ;;  %v1534_v52 = vor.u32 %v1722_v51, %v1533_v50  ;;  %v1738_v54 = vld [vmem:[#allocation8 + $0x194] sm:$0xf0]  ;;  %v1461_v58 = vld [vmem:[#allocation8 + $0x80] sm:$0xf]  ;;  %v1704_v59 = vld [vmem:[#allocation8 + $0x84] sm:$0xf0]  ;;  %v1398_v60 = vor.u32 %v1688_v57, %v1397_v55 }
  0x40   :  { %936 = vmatpush.bf16.msrb.mxu0 %v1438_v4  ;;  %v1598_v56 = vor.u32 %v1738_v54, %v1597_v53  ;;  %v1462_v61 = vor.u32 %v1704_v59, %v1461_v58  ;;  %v1525_v62 = vld [vmem:[#allocation8 + $0x100] sm:$0xf]  ;;  %v1736_v2 = vld [vmem:[#allocation8 + $0x184] sm:$0xf0]  ;;  %v1733_v4 = vld [vmem:[#allocation8 + $0x174] sm:$0xf] }
  0x41   :  { %v1589_v0 = vld [vmem:[#allocation8 + $0x180] sm:$0xf]  ;;  %v1701_v7 = vld [vmem:[#allocation8 + $0x74] sm:$0xf]  ;;  %v1455_v8 = vld [vmem:[#allocation8 + $0x78] sm:$0xf0] }
  0x42   :  { %994 = vmatpush.bf16.msrb.mxu2 %v1566_v63  ;;  %1023 = vmatpush.bf16.msrb.mxu3 %v1630_v5  ;;  %v1720_v63 = vld [vmem:[#allocation8 + $0x104] sm:$0xf0]  ;;  %v1583_v5 = vld [vmem:[#allocation8 + $0x178] sm:$0xf0]  ;;  %v1749_v9 = vld [vmem:[#allocation8 + $0x1f4] sm:$0xf]  ;;  %v1458_v10 = vor.u32 %v1701_v7, %v1455_v8 }
  0x43   :  { %965 = vmatpush.bf16.msrb.mxu1 %v1502_v6  ;;  %v1526_v1 = vor.u32 %v1720_v63, %v1525_v62  ;;  %v1586_v6 = vor.u32 %v1733_v4, %v1583_v5  ;;  %v1647_v11 = vld [vmem:[#allocation8 + $0x1f8] sm:$0xf0]  ;;  %v1717_v12 = vld [vmem:[#allocation8 + $0xf4] sm:$0xf]  ;;  %v1575_v23 = vld [vmem:[#allocation8 + $0x168] sm:$0xf0] }
  0x44   :  { %937 = vmatpush.bf16.msrb.mxu0 %v1430_v16  ;;  %v1519_v13 = vld [vmem:[#allocation8 + $0xf8] sm:$0xf0]  ;;  %v1699_v26 = vld [vmem:[#allocation8 + $0x64] sm:$0xf]  ;;  %v1697_v54 = vld [vmem:[#allocation8 + $0x54] sm:$0xf] }
  0x45   :  { %v122_v14 = vld [vmem:[#allocation7] sm:$0xf]  ;;  %v1522_v16 = vor.u32 %v1717_v12, %v1519_v13  ;;  %v1713_v62 = vld [vmem:[#allocation8 + $0xd4] sm:$0xf] }
  0x46   :  { %995 = vmatpush.bf16.msrb.mxu2 %v1558_v15  ;;  %1024 = vmatpush.bf16.msrb.mxu3 %v1622_v17  ;;  %v1650_v15 = vor.u32 %v1749_v9, %v1647_v11  ;;  %v1946_v18 = vperm.slane %v122_v14, 1  ;;  %v1948_v19 = vperm.slane %v122_v14, 0  ;;  %v1952_v37 = vperm.slane %v122_v14, 2  ;;  %v1567_v53 = vld [vmem:[#allocation8 + $0x158] sm:$0xf0] }
  0x47   :  { %329 = vmatmul.bf16.gmra.mxu0 %v1652_v33  ;;  %966 = vmatpush.bf16.msrb.mxu1 %v1494_v21  ;;  %v1731_v21 = vld [vmem:[#allocation8 + $0x164] sm:$0xf]  ;;  %v1954_v41 = vperm.slane %v122_v14, 3  ;;  %v1439_v55 = vld [vmem:[#allocation8 + $0x58] sm:$0xf0] }
  0x48   :  { %358 = vmatmul.bf16.gmra.mxu1 %v1652_v33  ;;  %938 = vmatpush.bf16.msrb.mxu0 %v1422_v28  ;;  %v1578_v25 = vor.u32 %v1731_v21, %v1575_v23  ;;  %v1747_v28 = vld [vmem:[#allocation8 + $0x1e4] sm:$0xf]  ;;  %v1442_v59 = vor.u32 %v1697_v54, %v1439_v55  ;;  %v1559_v23 = vld [vmem:[#allocation8 + $0x148] sm:$0xf0]  ;;  %v1693_v54 = vld [vmem:[#allocation8 + $0x34] sm:$0xf] }
  0x49   :  { %387 = vmatmul.bf16.gmra.mxu2 %v1652_v33  ;;  %416 = vmatmul.bf16.gmra.mxu3 %v1652_v33  ;;  %v1542_v33 = vor.u32 %v1724_v31, %v1541_v30  ;;  %v1639_v30 = vld [vmem:[#allocation8 + $0x1e8] sm:$0xf0]  ;;  %v1715_v31 = vld [vmem:[#allocation8 + $0xe4] sm:$0xf]  ;;  %v1423_v55 = vld [vmem:[#allocation8 + $0x38] sm:$0xf0] }
  0x4a   :  { %996 = vmatpush.bf16.msrb.mxu2 %v1550_v27  ;;  %1025 = vmatpush.bf16.msrb.mxu3 %v1614_v29  ;;  %v1447_v27 = vld [vmem:[#allocation8 + $0x68] sm:$0xf0] }
  0x4b   :  { %967 = vmatpush.bf16.msrb.mxu1 %v1486_v32  ;;  %v1450_v29 = vor.u32 %v1699_v26, %v1447_v27  ;;  %v1511_v32 = vld [vmem:[#allocation8 + $0xe8] sm:$0xf0] }
  0x4c   :  { %939 = vmatpush.bf16.msrb.mxu0 %v1414_v38  ;;  %v1514_v35 = vor.u32 %v1715_v31, %v1511_v32  ;;  %v1711_v31 = vld [vmem:[#allocation8 + $0xc4] sm:$0xf] }
  0x4e   :  { %997 = vmatpush.bf16.msrb.mxu2 %v1542_v33  ;;  %1026 = vmatpush.bf16.msrb.mxu3 %v1606_v42 }
  0x4f   :  { %968 = vmatpush.bf16.msrb.mxu1 %v1478_v43 }
  0x50   :  { %940 = vmatpush.bf16.msrb.mxu0 %v1406_v47 }
  0x52   :  { %998 = vmatpush.bf16.msrb.mxu2 %v1534_v52  ;;  %1027 = vmatpush.bf16.msrb.mxu3 %v1598_v56 }
  0x53   :  { %969 = vmatpush.bf16.msrb.mxu1 %v1470_v49  ;;  %v1729_v49 = vld [vmem:[#allocation8 + $0x154] sm:$0xf] }
  0x54   :  { %941 = vmatpush.bf16.msrb.mxu0 %v1398_v60  ;;  %v1570_v58 = vor.u32 %v1729_v49, %v1567_v53  ;;  %v1745_v60 = vld [vmem:[#allocation8 + $0x1d4] sm:$0xf]  ;;  %v1551_v53 = vld [vmem:[#allocation8 + $0x138] sm:$0xf0] }
  0x55   :  { %v1725_v49 = vld [vmem:[#allocation8 + $0x134] sm:$0xf] }
  0x56   :  { %999 = vmatpush.bf16.msrb.mxu2 %v1526_v1 }
  0x57   :  { %334 = vmatmul.bf16.gmra.mxu0 %v1653_v3  ;;  %970 = vmatpush.bf16.msrb.mxu1 %v1462_v61  ;;  %v1631_v61 = vld [vmem:[#allocation8 + $0x1d8] sm:$0xf0] }
  0x58   :  { %363 = vmatmul.bf16.gmra.mxu1 %v1653_v3  ;;  %1050 = vmatpush.bf16.msra.mxu0 %v1458_v10  ;;  %v1634_v1 = vor.u32 %v1745_v60, %v1631_v61  ;;  %v1426_v60 = vor.u32 %v1693_v54, %v1423_v55  ;;  %v1741_v61 = vld [vmem:[#allocation8 + $0x1b4] sm:$0xf]  ;;  %v1599_v54 = vld [vmem:[#allocation8 + $0x198] sm:$0xf0] }
  0x59   :  { %392 = vmatmul.bf16.gmra.mxu2 %v1653_v3  ;;  %421 = vmatmul.bf16.gmra.mxu3 %v1653_v3  ;;  %v1590_v3 = vor.u32 %v1736_v2, %v1589_v0  ;;  %v1503_v2 = vld [vmem:[#allocation8 + $0xd8] sm:$0xf0] }
  0x5a   :  { %1108 = vmatpush.bf16.msra.mxu2 %v1586_v6  ;;  %v1506_v7 = vor.u32 %v1713_v62, %v1503_v2  ;;  %v1615_v62 = vld [vmem:[#allocation8 + $0x1b8] sm:$0xf0] }
  0x5b   :  { %1028 = vmatpush.bf16.msrb.mxu3 %v1590_v3  ;;  %1079 = vmatpush.bf16.msra.mxu1 %v1522_v16  ;;  %v1727_v16 = vld [vmem:[#allocation8 + $0x144] sm:$0xf] }
  0x5c   :  { %1051 = vmatpush.bf16.msra.mxu0 %v1450_v29  ;;  %v1562_v27 = vor.u32 %v1727_v16, %v1559_v23  ;;  %v1743_v29 = vld [vmem:[#allocation8 + $0x1c4] sm:$0xf] }
  0x5d   :  { %v1723_v23 = vld [vmem:[#allocation8 + $0x124] sm:$0xf] }
  0x5e   :  { %1109 = vmatpush.bf16.msra.mxu2 %v1578_v25  ;;  %v1431_v25 = vld [vmem:[#allocation8 + $0x48] sm:$0xf0] }
  0x5f   :  { %1137 = vmatpush.bf16.msra.mxu3 %v1650_v15  ;;  %1080 = vmatpush.bf16.msra.mxu1 %v1514_v35 }
  0x60   :  { %1052 = vmatpush.bf16.msra.mxu0 %v1442_v59  ;;  %v1554_v59 = vor.u32 %v1725_v49, %v1551_v53  ;;  %v1737_v53 = vld [vmem:[#allocation8 + $0x194] sm:$0xf] }
  0x62   :  { %1110 = vmatpush.bf16.msra.mxu2 %v1570_v58 }
  0x63   :  { %1081 = vmatpush.bf16.msra.mxu1 %v1506_v7 }
  0x66   :  { %1111 = vmatpush.bf16.msra.mxu2 %v1562_v27 }
  0x67   :  { %339 = vmatmul.bf16.gmra.mxu0 %v1654_v34 }
  0x68   :  { %368 = vmatmul.bf16.gmra.mxu1 %v1654_v34 }
  0x69   :  { %397 = vmatmul.bf16.gmra.mxu2 %v1654_v34  ;;  %426 = vmatmul.bf16.gmra.mxu3 %v1654_v34  ;;  %v1642_v34 = vor.u32 %v1747_v28, %v1639_v30  ;;  %v1623_v30 = vld [vmem:[#allocation8 + $0x1c8] sm:$0xf0] }
  0x6a   :  { %1112 = vmatpush.bf16.msra.mxu2 %v1554_v59  ;;  %v1705_v59 = vld [vmem:[#allocation8 + $0x94] sm:$0xf] }
  0x6b   :  { %1138 = vmatpush.bf16.msra.mxu3 %v1642_v34  ;;  %v1495_v34 = vld [vmem:[#allocation8 + $0xc8] sm:$0xf0] }
  0x6f   :  { %1139 = vmatpush.bf16.msra.mxu3 %v1634_v1 }
  0xb4   :  { %v325_v17 = vpop.f32.mrf.mxu0 }
  0xb5   :  { %v354_v20 = vpop.f32.mrf.mxu1  ;;  %v326_v24 = vadd.f32 %v325_v17, %v1948_v19 }
  0xb6   :  { %v355_v22 = vadd.f32 %v354_v20, %v1946_v18 }
  0xb7   :  { %v464_v40 = vmul.f32 0.2, %v326_v24  ;;  %vm432_vm1 = vcmp.gt.f32.partialorder %v326_v24, 0.0 }
  0xb8   :  { %v465_v36 = vmul.f32 0.2, %v355_v22  ;;  %vm433_vm0 = vcmp.gt.f32.partialorder %v355_v22, 0.0 }
  0xb9   :  { %v496_v51 = vsel %vm432_vm1, %v326_v24, %v464_v40  ;;  %v1695_v24 = vld [vmem:[#allocation8 + $0x44] sm:$0xf] }
  0xba   :  { %v497_v48 = vsel %vm433_vm0, %v355_v22, %v465_v36  ;;  %v1434_v28 = vor.u32 %v1695_v24, %v1431_v25 }
  0xbc   :  { %v383_v33 = vpop.f32.mrf.mxu2  ;;  %v412_v38 = vpop.f32.mrf.mxu3  ;;  %1053 = vmatpush.bf16.msra.mxu0 %v1434_v28  ;;  %v1543_v28 = vld [vmem:[#allocation8 + $0x128] sm:$0xf0] }
  0xbd   :  { %v327_v39 = vpop.f32.mrf.mxu0  ;;  %v356_v43 = vpop.f32.mrf.mxu1  ;;  %v384_v46 = vadd.f32 %v383_v33, %v1952_v37  ;;  %v413_v50 = vadd.f32 %v412_v38, %v1954_v41  ;;  %v1626_v33 = vor.u32 %v1743_v29, %v1623_v30  ;;  %v1691_v29 = vld [vmem:[#allocation8 + $0x24] sm:$0xf]  ;;  %v1415_v30 = vld [vmem:[#allocation8 + $0x28] sm:$0xf0] }
  0xbe   :  { %v328_v42 = vadd.f32 %v327_v39, %v1948_v19  ;;  %v357_v44 = vadd.f32 %v356_v43, %v1946_v18  ;;  %v1498_v39 = vor.u32 %v1711_v31, %v1495_v34  ;;  %v1739_v34 = vld [vmem:[#allocation8 + $0x1a4] sm:$0xf] }
  0xbf   :  { %v466_v3 = vmul.f32 0.2, %v384_v46  ;;  %vm434_vm4 = vcmp.gt.f32.partialorder %v384_v46, 0.0  ;;  %v467_v8 = vmul.f32 0.2, %v413_v50  ;;  %vm435_vm5 = vcmp.gt.f32.partialorder %v413_v50, 0.0  ;;  %1140 = vmatpush.bf16.msra.mxu3 %v1626_v33 }
  0xc0   :  { %vm436_vm2 = vcmp.gt.f32.partialorder %v328_v42, 0.0  ;;  %v468_v45 = vmul.f32 0.2, %v328_v42  ;;  %vm437_vm3 = vcmp.gt.f32.partialorder %v357_v44, 0.0  ;;  %v469_v47 = vmul.f32 0.2, %v357_v44  ;;  %1082 = vmatpush.bf16.msra.mxu1 %v1498_v39  ;;  %1054 = vmatpush.bf16.msra.mxu0 %v1426_v60 }
  0xc1   :  { %v498_v14 = vsel %vm434_vm4, %v384_v46, %v466_v3  ;;  %v499_v21 = vsel %vm435_vm5, %v413_v50, %v467_v8  ;;  %v1618_v3 = vor.u32 %v1741_v61, %v1615_v62  ;;  %v1418_v33 = vor.u32 %v1691_v29, %v1415_v30 }
  0xc2   :  { %v500_v52 = vsel %vm436_vm2, %v328_v42, %v468_v45  ;;  %v501_v57 = vsel %vm437_vm3, %v357_v44, %v469_v47 }
  0xc3   :  { %v1960_v56 = vpack.c.bf16 %v500_v52, %v496_v51  ;;  %v1962_v0 = vpack.c.bf16 %v501_v57, %v497_v48  ;;  %1141 = vmatpush.bf16.msra.mxu3 %v1618_v3  ;;  %v1471_v3 = vld [vmem:[#allocation8 + $0x98] sm:$0xf0] }
  0xc4   :  { %v385_v63 = vpop.f32.mrf.mxu2  ;;  %v414_v5 = vpop.f32.mrf.mxu3  ;;  %1055 = vmatpush.bf16.msra.mxu0 %v1418_v33 }
  0xc5   :  { %v386_v4 = vadd.f32 %v385_v63, %v1952_v37  ;;  %v330_v6 = vpop.f32.mrf.mxu0  ;;  %942 = vmatmul.bf16.vlgmr.msrb.gmra.mxu0 %v1960_v56  ;;  %v415_v9 = vadd.f32 %v414_v5, %v1954_v41  ;;  %v359_v10 = vpop.f32.mrf.mxu1  ;;  %971 = vmatmul.bf16.vlgmr.msrb.gmra.mxu1 %v1962_v0  ;;  %v1709_v63 = vld [vmem:[#allocation8 + $0xb4] sm:$0xf] }
  0xc6   :  { %v360_v13 = vadd.f32 %v359_v10, %v1946_v18  ;;  %v331_v17 = vadd.f32 %v330_v6, %v1948_v19 }
  0xc7   :  { %vm438_vm6 = vcmp.gt.f32.partialorder %v386_v4, 0.0  ;;  %v470_v11 = vmul.f32 0.2, %v386_v4  ;;  %vm439_vm7 = vcmp.gt.f32.partialorder %v415_v9, 0.0  ;;  %v471_v12 = vmul.f32 0.2, %v415_v9 }
  0xc8   :  { %v473_v35 = vmul.f32 0.2, %v360_v13  ;;  %v472_v40 = vmul.f32 0.2, %v331_v17  ;;  %vm441_vm8 = vcmp.gt.f32.partialorder %v360_v13, 0.0  ;;  %vm440_vm9 = vcmp.gt.f32.partialorder %v331_v17, 0.0 }
  0xc9   :  { %v502_v15 = vsel %vm438_vm6, %v386_v4, %v470_v11  ;;  %v503_v22 = vsel %vm439_vm7, %v415_v9, %v471_v12  ;;  %v1487_v4 = vld [vmem:[#allocation8 + $0xb8] sm:$0xf0] }
  0xca   :  { %v1970_v20 = vpack.c.bf16 %v502_v15, %v498_v14  ;;  %v1972_v26 = vpack.c.bf16 %v503_v22, %v499_v21  ;;  %v505_v48 = vsel %vm441_vm8, %v360_v13, %v473_v35  ;;  %v504_v51 = vsel %vm440_vm9, %v331_v17, %v472_v40  ;;  %v1607_v35 = vld [vmem:[#allocation8 + $0x1a8] sm:$0xf0] }
  0xcb   :  { %v1490_v9 = vor.u32 %v1709_v63, %v1487_v4  ;;  %v1610_v40 = vor.u32 %v1739_v34, %v1607_v35  ;;  %v1735_v34 = vld [vmem:[#allocation8 + $0x184] sm:$0xf]  ;;  %v1591_v35 = vld [vmem:[#allocation8 + $0x188] sm:$0xf0] }
  0xcc   :  { %v388_v32 = vpop.f32.mrf.mxu2  ;;  %1000 = vmatmul.bf16.vlgmr.msrb.gmra.mxu2 %v1970_v20  ;;  %v417_v36 = vpop.f32.mrf.mxu3  ;;  %1029 = vmatmul.bf16.vlgmr.msrb.gmra.mxu3 %v1972_v26 }
  0xcd   :  { %v332_v38 = vpop.f32.mrf.mxu0  ;;  %v361_v43 = vpop.f32.mrf.mxu1  ;;  %v389_v46 = vadd.f32 %v388_v32, %v1952_v37  ;;  %v418_v50 = vadd.f32 %v417_v36, %v1954_v41  ;;  %1083 = vmatpush.bf16.msra.mxu1 %v1490_v9  ;;  %v1546_v32 = vor.u32 %v1723_v23, %v1543_v28  ;;  %v1707_v36 = vld [vmem:[#allocation8 + $0xa4] sm:$0xf]  ;;  %1142 = vmatpush.bf16.msra.mxu3 %v1610_v40  ;;  %v1399_v9 = vld [vmem:[#allocation8 + $0x8] sm:$0xf0] }
  0xce   :  { %v333_v42 = vadd.f32 %v332_v38, %v1948_v19  ;;  %v362_v44 = vadd.f32 %v361_v43, %v1946_v18 }
  0xcf   :  { %v474_v5 = vmul.f32 0.2, %v389_v46  ;;  %v475_v10 = vmul.f32 0.2, %v418_v50  ;;  %vm442_vm12 = vcmp.gt.f32.partialorder %v389_v46, 0.0  ;;  %vm443_vm14 = vcmp.gt.f32.partialorder %v418_v50, 0.0  ;;  %1113 = vmatpush.bf16.msra.mxu2 %v1546_v32 }
  0xd0   :  { %v476_v45 = vmul.f32 0.2, %v333_v42  ;;  %vm444_vm10 = vcmp.gt.f32.partialorder %v333_v42, 0.0  ;;  %v477_v47 = vmul.f32 0.2, %v362_v44  ;;  %vm445_vm11 = vcmp.gt.f32.partialorder %v362_v44, 0.0 }
  0xd1   :  { %v506_v21 = vsel %vm442_vm12, %v389_v46, %v474_v5  ;;  %v507_v25 = vsel %vm443_vm14, %v418_v50, %v475_v10  ;;  %v1721_v46 = vld [vmem:[#allocation8 + $0x114] sm:$0xf]  ;;  %v1703_v10 = vld [vmem:[#allocation8 + $0x84] sm:$0xf] }
  0xd2   :  { %v508_v52 = vsel %vm444_vm10, %v333_v42, %v476_v45  ;;  %v509_v58 = vsel %vm445_vm11, %v362_v44, %v477_v47  ;;  %v1479_v42 = vld [vmem:[#allocation8 + $0xa8] sm:$0xf0]  ;;  %v1535_v47 = vld [vmem:[#allocation8 + $0x118] sm:$0xf0] }
  0xd3   :  { %v1980_v57 = vpack.c.bf16 %v508_v52, %v504_v51  ;;  %v1982_v2 = vpack.c.bf16 %v509_v58, %v505_v48  ;;  %v1482_v45 = vor.u32 %v1707_v36, %v1479_v42  ;;  %v1689_v48 = vld [vmem:[#allocation8 + $0x14] sm:$0xf]  ;;  %v1538_v51 = vor.u32 %v1721_v46, %v1535_v47  ;;  %v1407_v52 = vld [vmem:[#allocation8 + $0x18] sm:$0xf0] }
  0xd4   :  { %v390_v1 = vpop.f32.mrf.mxu2  ;;  %v419_v7 = vpop.f32.mrf.mxu3  ;;  %v1410_v58 = vor.u32 %v1689_v48, %v1407_v52 }
  0xd5   :  { %v391_v6 = vadd.f32 %v390_v1, %v1952_v37  ;;  %v335_v8 = vpop.f32.mrf.mxu0  ;;  %947 = vmatmul.bf16.gmra.mxu0 %v1980_v57  ;;  %v420_v11 = vadd.f32 %v419_v7, %v1954_v41  ;;  %v364_v13 = vpop.f32.mrf.mxu1  ;;  %976 = vmatmul.bf16.gmra.mxu1 %v1982_v2  ;;  %v1602_v1 = vor.u32 %v1737_v53, %v1599_v54 }
  0xd6   :  { %v1988_v12 = vadd.f32 %v335_v8, %v1948_v19  ;;  %v365_v16 = vadd.f32 %v364_v13, %v1946_v18  ;;  %1084 = vmatpush.bf16.msra.mxu1 %v1482_v45  ;;  %1114 = vmatpush.bf16.msra.mxu2 %v1538_v51  ;;  %v1474_v7 = vor.u32 %v1705_v59, %v1471_v3  ;;  %v1687_v8 = vld [vmem:[#allocation8 + $0x4] sm:$0xf] }
  0xd7   :  { %v478_v14 = vmul.f32 0.2, %v391_v6  ;;  %vm446_vm13 = vcmp.gt.f32.partialorder %v391_v6, 0.0  ;;  %v479_v15 = vmul.f32 0.2, %v420_v11  ;;  %vm447_vm15 = vcmp.gt.f32.partialorder %v420_v11, 0.0  ;;  %1056 = vmatpush.bf16.msra.mxu0 %v1410_v58  ;;  %1143 = vmatpush.bf16.msra.mxu3 %v1602_v1 }
  0xd8   :  { %v480_v17 = vmul.f32 0.2, %v1988_v12  ;;  %v481_v38 = vmul.f32 0.2, %v365_v16  ;;  %vm449_vm0 = vcmp.gt.f32.partialorder %v365_v16, 0.0  ;;  %vm448_vm1 = vcmp.gt.f32.partialorder %v1988_v12, 0.0 }
  0xd9   :  { %v510_v22 = vsel %vm446_vm13, %v391_v6, %v478_v14  ;;  %v511_v27 = vsel %vm447_vm15, %v420_v11, %v479_v15  ;;  %v1402_v14 = vor.u32 %v1687_v8, %v1399_v9  ;;  %v1463_v15 = vld [vmem:[#allocation8 + $0x88] sm:$0xf0] }
  0xda   :  { %v1993_v24 = vpack.c.bf16 %v510_v22, %v506_v21  ;;  %v1995_v31 = vpack.c.bf16 %v511_v27, %v507_v25  ;;  %v513_v61 = vsel %vm449_vm0, %v365_v16, %v481_v38  ;;  %v512_v5 = vsel %vm448_vm1, %v1988_v12, %v480_v17  ;;  %v1719_v16 = vld [vmem:[#allocation8 + $0x104] sm:$0xf]  ;;  %v1527_v21 = vld [vmem:[#allocation8 + $0x108] sm:$0xf0]  ;;  %1085 = vmatpush.bf16.msra.mxu1 %v1474_v7 }
  0xdb   :  { %v1466_v25 = vor.u32 %v1703_v10, %v1463_v15  ;;  %v1530_v12 = vor.u32 %v1719_v16, %v1527_v21  ;;  %1057 = vmatpush.bf16.msra.mxu0 %v1402_v14  ;;  %v1594_v38 = vor.u32 %v1735_v34, %v1591_v35 }
  0xdc   :  { %v393_v39 = vpop.f32.mrf.mxu2  ;;  %1005 = vmatmul.bf16.gmra.mxu2 %v1993_v24  ;;  %v422_v43 = vpop.f32.mrf.mxu3  ;;  %1034 = vmatmul.bf16.gmra.mxu3 %v1995_v31 }
  0xdd   :  { %v337_v44 = vpop.f32.mrf.mxu0  ;;  %v366_v50 = vpop.f32.mrf.mxu1  ;;  %v394_v62 = vadd.f32 %v393_v39, %v1952_v37  ;;  %v423_v4 = vadd.f32 %v422_v43, %v1954_v41  ;;  %1115 = vmatpush.bf16.msra.mxu2 %v1530_v12  ;;  %1144 = vmatpush.bf16.msra.mxu3 %v1594_v38 }
  0xde   :  { %v338_v49 = vadd.f32 %v337_v44, %v1948_v19  ;;  %v367_v55 = vadd.f32 %v366_v50, %v1946_v18  ;;  %1086 = vmatpush.bf16.msra.mxu1 %v1466_v25 }
  0xdf   :  { %v482_v17 = vmul.f32 0.2, %v394_v62  ;;  %vm450_vm4 = vcmp.gt.f32.partialorder %v394_v62, 0.0  ;;  %v483_v30 = vmul.f32 0.2, %v423_v4  ;;  %vm451_vm6 = vcmp.gt.f32.partialorder %v423_v4, 0.0 }
  0xe0   :  { %v484_v60 = vmul.f32 0.2, %v338_v49  ;;  %vm452_vm2 = vcmp.gt.f32.partialorder %v338_v49, 0.0  ;;  %v485_v63 = vmul.f32 0.2, %v367_v55  ;;  %vm453_vm3 = vcmp.gt.f32.partialorder %v367_v55, 0.0 }
  0xe1   :  { %v514_v42 = vsel %vm450_vm4, %v394_v62, %v482_v17  ;;  %v515_v46 = vsel %vm451_vm6, %v423_v4, %v483_v30 }
  0xe2   :  { %v516_v6 = vsel %vm452_vm2, %v338_v49, %v484_v60  ;;  %v517_v13 = vsel %vm453_vm3, %v367_v55, %v485_v63 }
  0xe3   :  { %v2006_v11 = vpack.c.bf16 %v516_v6, %v512_v5  ;;  %v2008_v23 = vpack.c.bf16 %v517_v13, %v513_v61 }
  0xe4   :  { %v395_v22 = vpop.f32.mrf.mxu2  ;;  %v424_v28 = vpop.f32.mrf.mxu3 }
  0xe5   :  { %v396_v27 = vadd.f32 %v395_v22, %v1952_v37  ;;  %v340_v29 = vpop.f32.mrf.mxu0  ;;  %952 = vmatmul.bf16.gmra.mxu0 %v2006_v11  ;;  %v425_v32 = vadd.f32 %v424_v28, %v1954_v41  ;;  %v369_v33 = vpop.f32.mrf.mxu1  ;;  %981 = vmatmul.bf16.gmra.mxu1 %v2008_v23 }
  0xe6   :  { %v370_v40 = vadd.f32 %v369_v33, %v1946_v18  ;;  %v341_v44 = vadd.f32 %v340_v29, %v1948_v19 }
  0xe7   :  { %v486_v36 = vmul.f32 0.2, %v396_v27  ;;  %vm454_vm5 = vcmp.gt.f32.partialorder %v396_v27, 0.0  ;;  %v487_v39 = vmul.f32 0.2, %v425_v32  ;;  %vm455_vm7 = vcmp.gt.f32.partialorder %v425_v32, 0.0 }
  0xe8   :  { %v489_v50 = vmul.f32 0.2, %v370_v40  ;;  %v488_v53 = vmul.f32 0.2, %v341_v44  ;;  %vm457_vm8 = vcmp.gt.f32.partialorder %v370_v40, 0.0  ;;  %vm456_vm9 = vcmp.gt.f32.partialorder %v341_v44, 0.0 }
  0xe9   :  { %v518_v43 = vsel %vm454_vm5, %v396_v27, %v486_v36  ;;  %v519_v47 = vsel %vm455_vm7, %v425_v32, %v487_v39 }
  0xea   :  { %v538_v45 = vpack.c.bf16 %v518_v43, %v514_v42  ;;  %v539_v48 = vpack.c.bf16 %v519_v47, %v515_v46  ;;  %v521_v62 = vsel %vm457_vm8, %v370_v40, %v489_v50  ;;  %v520_v1 = vsel %vm456_vm9, %v341_v44, %v488_v53 }
  0xec   :  { %v398_v49 = vpop.f32.mrf.mxu2  ;;  %1010 = vmatmul.bf16.gmra.mxu2 %v538_v45  ;;  %v427_v51 = vpop.f32.mrf.mxu3  ;;  %1039 = vmatmul.bf16.gmra.mxu3 %v539_v48 }
  0xed   :  { %v342_v52 = vpop.f32.mrf.mxu0  ;;  %v371_v55 = vpop.f32.mrf.mxu1  ;;  %v399_v60 = vadd.f32 %v398_v49, %v1952_v37  ;;  %v428_v63 = vadd.f32 %v427_v51, %v1954_v41 }
  0xee   :  { %v343_v54 = vadd.f32 %v342_v52, %v1948_v19  ;;  %v372_v58 = vadd.f32 %v371_v55, %v1946_v18 }
  0xef   :  { %v490_v7 = vmul.f32 0.2, %v399_v60  ;;  %v491_v9 = vmul.f32 0.2, %v428_v63  ;;  %vm458_vm12 = vcmp.gt.f32.partialorder %v399_v60, 0.0  ;;  %vm459_vm14 = vcmp.gt.f32.partialorder %v428_v63, 0.0 }
  0xf0   :  { %v492_v59 = vmul.f32 0.2, %v343_v54  ;;  %vm460_vm10 = vcmp.gt.f32.partialorder %v343_v54, 0.0  ;;  %v493_v61 = vmul.f32 0.2, %v372_v58  ;;  %vm461_vm11 = vcmp.gt.f32.partialorder %v372_v58, 0.0 }
  0xf1   :  { %v522_v15 = vsel %vm458_vm12, %v399_v60, %v490_v7  ;;  %v523_v22 = vsel %vm459_vm14, %v428_v63, %v491_v9 }
  0xf2   :  { %v524_v3 = vsel %vm460_vm10, %v343_v54, %v492_v59  ;;  %v525_v5 = vsel %vm461_vm11, %v372_v58, %v493_v61 }
  0xf3   :  { %v540_v4 = vpack.c.bf16 %v524_v3, %v520_v1  ;;  %v541_v19 = vpack.c.bf16 %v525_v5, %v521_v62 }
  0xf4   :  { %v400_v6 = vpop.f32.mrf.mxu2  ;;  %v429_v18 = vpop.f32.mrf.mxu3 }
  0xf5   :  { %v401_v8 = vadd.f32 %v400_v6, %v1952_v37  ;;  %957 = vmatmul.bf16.gmra.mxu0 %v540_v4  ;;  %v430_v10 = vadd.f32 %v429_v18, %v1954_v41  ;;  %986 = vmatmul.bf16.gmra.mxu1 %v541_v19  ;;  %v2036_v41 = vld [vmem:[%s2070_s4] sm:$0x3]  ;;  %s1900_s4 = smov [#allocation10]  }
  0xf6   :  { %s1234_s17 = sshll.u32 %s1900_s4, 4  ;;  %s1235_s17 = int_to_ptr.vmem [resolvable:$true] %s1234_s17 }
  0xf7   :  { %v494_v13 = vmul.f32 0.2, %v401_v8  ;;  %vm462_vm13 = vcmp.gt.f32.partialorder %v401_v8, 0.0  ;;  %v495_v14 = vmul.f32 0.2, %v430_v10  ;;  %vm463_vm15 = vcmp.gt.f32.partialorder %v430_v10, 0.0 }
  0xf9   :  { %v526_v16 = vsel %vm462_vm13, %v401_v8, %v494_v13  ;;  %v527_v25 = vsel %vm463_vm15, %v430_v10, %v495_v14 }
  0xfa   :  { %v542_v21 = vpack.c.bf16 %v526_v16, %v522_v15  ;;  %v543_v12 = vpack.c.bf16 %v527_v25, %v523_v22 }
  0xfc   :  { %1015 = vmatmul.bf16.gmra.mxu2 %v542_v21  ;;  %1044 = vmatmul.bf16.gmra.mxu3 %v543_v12 }
 0x105   :  { %1058 = vmatmul.bf16.vlgmr.msra.gmra.mxu0 %v1960_v56  ;;  %1087 = vmatmul.bf16.vlgmr.msra.gmra.mxu1 %v1962_v0  ;;  %v2039_v0 = vperm.slane %v2036_v41, 0 }
 0x10c   :  { %1116 = vmatmul.bf16.vlgmr.msra.gmra.mxu2 %v1970_v20  ;;  %1145 = vmatmul.bf16.vlgmr.msra.gmra.mxu3 %v1972_v26 }
 0x115   :  { %1063 = vmatmul.bf16.gmra.mxu0 %v1980_v57  ;;  %1092 = vmatmul.bf16.gmra.mxu1 %v1982_v2 }
 0x11c   :  { %1121 = vmatmul.bf16.gmra.mxu2 %v1993_v24  ;;  %1150 = vmatmul.bf16.gmra.mxu3 %v1995_v31 }
 0x125   :  { %1068 = vmatmul.bf16.gmra.mxu0 %v2006_v11  ;;  %1097 = vmatmul.bf16.gmra.mxu1 %v2008_v23 }
 0x12c   :  { %1126 = vmatmul.bf16.gmra.mxu2 %v538_v45  ;;  %1155 = vmatmul.bf16.gmra.mxu3 %v539_v48 }
 0x135   :  { %1073 = vmatmul.bf16.gmra.mxu0 %v540_v4  ;;  %1102 = vmatmul.bf16.gmra.mxu1 %v541_v19 }
 0x13c   :  { %1131 = vmatmul.bf16.gmra.mxu2 %v542_v21  ;;  %1160 = vmatmul.bf16.gmra.mxu3 %v543_v12 }
 0x142   :  { %v943_v37 = vpop.f32.mrf.mxu0  ;;  %v972_v56 = vpop.f32.mrf.mxu1 }
 0x143   :  { %v944_v20 = vadd.f32 %v943_v37, %v2039_v0 }
 0x145   :  { %v973_v2 = vadd.f32 %v972_v56, %v944_v20 }
 0x14a   :  { %v945_v26 = vpop.f32.mrf.mxu0  ;;  %v974_v57 = vpop.f32.mrf.mxu1 }
 0x14b   :  { %v946_v23 = vadd.f32 %v945_v26, %v2039_v0 }
 0x14d   :  { %v975_v30 = vadd.f32 %v974_v57, %v946_v23 }
 0x14f   :  { %v1001_v24 = vpop.f32.mrf.mxu2  ;;  %v1030_v11 = vpop.f32.mrf.mxu3 }
 0x150   :  { %v1002_v31 = vadd.f32 %v1001_v24, %v973_v2 }
 0x152   :  { %v1031_v17 = vadd.f32 %v1030_v11, %v1002_v31  ;;  %v948_v27 = vpop.f32.mrf.mxu0  ;;  %v977_v28 = vpop.f32.mrf.mxu1 }
 0x153   :  { %v949_v36 = vadd.f32 %v948_v27, %v2039_v0 }
 0x154   :  { %vm1166_vm0 = vcmp.gt.f32.partialorder %v1031_v17, 0.0  ;;  %v1182_v29 = vmul.f32 0.2, %v1031_v17 }
 0x155   :  { %v978_v43 = vadd.f32 %v977_v28, %v949_v36 }
 0x156   :  { %v1198_v32 = vsel %vm1166_vm0, %v1031_v17, %v1182_v29 }
 0x157   :  { %1214 = vst [vmem:[#allocation10] sm:$0xff] %v1198_v32  ;;  %v1003_v33 = vpop.f32.mrf.mxu2  ;;  %v1032_v35 = vpop.f32.mrf.mxu3 }
 0x158   :  { %v1004_v34 = vadd.f32 %v1003_v33, %v975_v30  ;;  %v2050_v30 = vperm.slane %v2036_v41, 1 }
 0x15a   :  { %v1033_v38 = vadd.f32 %v1032_v35, %v1004_v34  ;;  %v950_v39 = vpop.f32.mrf.mxu0  ;;  %v979_v40 = vpop.f32.mrf.mxu1 }
 0x15b   :  { %v951_v48 = vadd.f32 %v950_v39, %v2039_v0 }
 0x15c   :  { %vm1168_vm1 = vcmp.gt.f32.partialorder %v1033_v38, 0.0  ;;  %v1184_v42 = vmul.f32 0.2, %v1033_v38 }
 0x15d   :  { %v980_v53 = vadd.f32 %v979_v40, %v951_v48 }
 0x15e   :  { %v1200_v44 = vsel %vm1168_vm1, %v1033_v38, %v1184_v42 }
 0x15f   :  { %1216 = vst [vmem:[#allocation10 + $0x10] sm:$0xff] %v1200_v44  ;;  %v1006_v45 = vpop.f32.mrf.mxu2  ;;  %v1035_v47 = vpop.f32.mrf.mxu3 }
 0x160   :  { %v1007_v46 = vadd.f32 %v1006_v45, %v978_v43 }
 0x162   :  { %v1036_v49 = vadd.f32 %v1035_v47, %v1007_v46  ;;  %v953_v50 = vpop.f32.mrf.mxu0  ;;  %v982_v51 = vpop.f32.mrf.mxu1 }
 0x163   :  { %v954_v60 = vadd.f32 %v953_v50, %v2039_v0 }
 0x164   :  { %vm1170_vm2 = vcmp.gt.f32.partialorder %v1036_v49, 0.0  ;;  %v1186_v52 = vmul.f32 0.2, %v1036_v49 }
 0x165   :  { %v983_v3 = vadd.f32 %v982_v51, %v954_v60 }
 0x166   :  { %v1202_v54 = vsel %vm1170_vm2, %v1036_v49, %v1186_v52 }
 0x167   :  { %1218 = vst [vmem:[#allocation10 + $0x20] sm:$0xff] %v1202_v54  ;;  %v1008_v55 = vpop.f32.mrf.mxu2  ;;  %v1037_v59 = vpop.f32.mrf.mxu3 }
 0x168   :  { %v1009_v58 = vadd.f32 %v1008_v55, %v980_v53 }
 0x16a   :  { %v1038_v61 = vadd.f32 %v1037_v59, %v1009_v58  ;;  %v955_v62 = vpop.f32.mrf.mxu0  ;;  %v984_v63 = vpop.f32.mrf.mxu1 }
 0x16b   :  { %v956_v7 = vadd.f32 %v955_v62, %v2039_v0 }
 0x16c   :  { %vm1172_vm3 = vcmp.gt.f32.partialorder %v1038_v61, 0.0  ;;  %v1188_v1 = vmul.f32 0.2, %v1038_v61 }
 0x16d   :  { %v985_v13 = vadd.f32 %v984_v63, %v956_v7 }
 0x16e   :  { %v1204_v4 = vsel %vm1172_vm3, %v1038_v61, %v1188_v1 }
 0x16f   :  { %1220 = vst [vmem:[#allocation10 + $0x30] sm:$0xff] %v1204_v4  ;;  %v1011_v5 = vpop.f32.mrf.mxu2  ;;  %v1040_v19 = vpop.f32.mrf.mxu3 }
 0x170   :  { %v1012_v6 = vadd.f32 %v1011_v5, %v983_v3 }
 0x172   :  { %v1041_v8 = vadd.f32 %v1040_v19, %v1012_v6  ;;  %v958_v18 = vpop.f32.mrf.mxu0  ;;  %v987_v9 = vpop.f32.mrf.mxu1 }
 0x173   :  { %v959_v22 = vadd.f32 %v958_v18, %v2039_v0 }
 0x174   :  { %vm1174_vm4 = vcmp.gt.f32.partialorder %v1041_v8, 0.0  ;;  %v1190_v10 = vmul.f32 0.2, %v1041_v8 }
 0x175   :  { %v988_v20 = vadd.f32 %v987_v9, %v959_v22 }
 0x176   :  { %v1206_v14 = vsel %vm1174_vm4, %v1041_v8, %v1190_v10 }
 0x177   :  { %1222 = vst [vmem:[#allocation10 + $0x40] sm:$0xff] %v1206_v14  ;;  %v1013_v15 = vpop.f32.mrf.mxu2  ;;  %v1042_v21 = vpop.f32.mrf.mxu3 }
 0x178   :  { %v1014_v16 = vadd.f32 %v1013_v15, %v985_v13 }
 0x17a   :  { %v1043_v25 = vadd.f32 %v1042_v21, %v1014_v16  ;;  %v960_v12 = vpop.f32.mrf.mxu0  ;;  %v989_v37 = vpop.f32.mrf.mxu1 }
 0x17b   :  { %v961_v31 = vadd.f32 %v960_v12, %v2039_v0 }
 0x17c   :  { %vm1176_vm5 = vcmp.gt.f32.partialorder %v1043_v25, 0.0  ;;  %v1192_v56 = vmul.f32 0.2, %v1043_v25 }
 0x17d   :  { %v990_v28 = vadd.f32 %v989_v37, %v961_v31 }
 0x17e   :  { %v1208_v26 = vsel %vm1176_vm5, %v1043_v25, %v1192_v56 }
 0x17f   :  { %1224 = vst [vmem:[#allocation10 + $0x50] sm:$0xff] %v1208_v26  ;;  %v1016_v57 = vpop.f32.mrf.mxu2  ;;  %v1045_v24 = vpop.f32.mrf.mxu3 }
 0x180   :  { %v1017_v2 = vadd.f32 %v1016_v57, %v988_v20 }
 0x182   :  { %v1046_v11 = vadd.f32 %v1045_v24, %v1017_v2  ;;  %v1059_v23 = vpop.f32.mrf.mxu0  ;;  %v1088_v17 = vpop.f32.mrf.mxu1 }
 0x183   :  { %v1060_v35 = vadd.f32 %v1059_v23, %v2050_v30 }
 0x184   :  { %vm1178_vm6 = vcmp.gt.f32.partialorder %v1046_v11, 0.0  ;;  %v1194_v27 = vmul.f32 0.2, %v1046_v11 }
 0x185   :  { %v1089_v40 = vadd.f32 %v1088_v17, %v1060_v35 }
 0x186   :  { %v1210_v29 = vsel %vm1178_vm6, %v1046_v11, %v1194_v27 }
 0x187   :  { %1226 = vst [vmem:[#allocation10 + $0x60] sm:$0xff] %v1210_v29  ;;  %v1018_v32 = vpop.f32.mrf.mxu2  ;;  %v1047_v34 = vpop.f32.mrf.mxu3 }
 0x188   :  { %v1019_v33 = vadd.f32 %v1018_v32, %v990_v28 }
 0x18a   :  { %v1048_v36 = vadd.f32 %v1047_v34, %v1019_v33  ;;  %v1061_v38 = vpop.f32.mrf.mxu0  ;;  %v1090_v39 = vpop.f32.mrf.mxu1 }
 0x18b   :  { %v1062_v41 = vadd.f32 %v1061_v38, %v2050_v30 }
 0x18c   :  { %vm1180_vm7 = vcmp.gt.f32.partialorder %v1048_v36, 0.0  ;;  %v1196_v0 = vmul.f32 0.2, %v1048_v36 }
 0x18d   :  { %v1091_v50 = vadd.f32 %v1090_v39, %v1062_v41 }
 0x18e   :  { %v1212_v42 = vsel %vm1180_vm7, %v1048_v36, %v1196_v0 }
 0x18f   :  { %1228 = vst [vmem:[#allocation10 + $0x70] sm:$0xff] %v1212_v42  ;;  %v1117_v43 = vpop.f32.mrf.mxu2  ;;  %v1146_v45 = vpop.f32.mrf.mxu3 }
 0x190   :  { %v1118_v44 = vadd.f32 %v1117_v43, %v1089_v40 }
 0x192   :  { %v1147_v46 = vadd.f32 %v1146_v45, %v1118_v44  ;;  %v1064_v47 = vpop.f32.mrf.mxu0  ;;  %v1093_v48 = vpop.f32.mrf.mxu1 }
 0x193   :  { %v1065_v55 = vadd.f32 %v1064_v47, %v2050_v30 }
 0x194   :  { %vm1167_vm8 = vcmp.gt.f32.partialorder %v1147_v46, 0.0  ;;  %v1183_v49 = vmul.f32 0.2, %v1147_v46 }
 0x195   :  { %v1094_v62 = vadd.f32 %v1093_v48, %v1065_v55 }
 0x196   :  { %v1199_v51 = vsel %vm1167_vm8, %v1147_v46, %v1183_v49 }
 0x197   :  { %1215 = vst [vmem:[#allocation10 + $0x8] sm:$0xff] %v1199_v51  ;;  %v1119_v52 = vpop.f32.mrf.mxu2  ;;  %v1148_v54 = vpop.f32.mrf.mxu3 }
 0x198   :  { %v1120_v53 = vadd.f32 %v1119_v52, %v1091_v50 }
 0x19a   :  { %v1149_v58 = vadd.f32 %v1148_v54, %v1120_v53  ;;  %v1066_v59 = vpop.f32.mrf.mxu0  ;;  %v1095_v61 = vpop.f32.mrf.mxu1 }
 0x19b   :  { %v1067_v5 = vadd.f32 %v1066_v59, %v2050_v30 }
 0x19c   :  { %vm1169_vm9 = vcmp.gt.f32.partialorder %v1149_v58, 0.0  ;;  %v1185_v60 = vmul.f32 0.2, %v1149_v58 }
 0x19d   :  { %v1096_v8 = vadd.f32 %v1095_v61, %v1067_v5 }
 0x19e   :  { %v1201_v63 = vsel %vm1169_vm9, %v1149_v58, %v1185_v60 }
 0x19f   :  { %1217 = vst [vmem:[#allocation10 + $0x18] sm:$0xff] %v1201_v63  ;;  %v1122_v1 = vpop.f32.mrf.mxu2  ;;  %v1151_v4 = vpop.f32.mrf.mxu3 }
 0x1a0   :  { %v1123_v3 = vadd.f32 %v1122_v1, %v1094_v62 }
 0x1a2   :  { %v1152_v6 = vadd.f32 %v1151_v4, %v1123_v3  ;;  %v1069_v19 = vpop.f32.mrf.mxu0  ;;  %v1098_v9 = vpop.f32.mrf.mxu1 }
 0x1a3   :  { %v1070_v15 = vadd.f32 %v1069_v19, %v2050_v30 }
 0x1a4   :  { %vm1171_vm10 = vcmp.gt.f32.partialorder %v1152_v6, 0.0  ;;  %v1187_v7 = vmul.f32 0.2, %v1152_v6 }
 0x1a5   :  { %v1099_v25 = vadd.f32 %v1098_v9, %v1070_v15 }
 0x1a6   :  { %v1203_v18 = vsel %vm1171_vm10, %v1152_v6, %v1187_v7 }
 0x1a7   :  { %1219 = vst [vmem:[#allocation10 + $0x28] sm:$0xff] %v1203_v18  ;;  %v1124_v10 = vpop.f32.mrf.mxu2  ;;  %v1153_v14 = vpop.f32.mrf.mxu3 }
 0x1a8   :  { %v1125_v13 = vadd.f32 %v1124_v10, %v1096_v8 }
 0x1aa   :  { %v1154_v16 = vadd.f32 %v1153_v14, %v1125_v13  ;;  %v1071_v21 = vpop.f32.mrf.mxu0  ;;  %v1100_v26 = vpop.f32.mrf.mxu1 }
 0x1ab   :  { %v1072_v57 = vadd.f32 %v1071_v21, %v2050_v30 }
 0x1ac   :  { %vm1173_vm11 = vcmp.gt.f32.partialorder %v1154_v16, 0.0  ;;  %v1189_v22 = vmul.f32 0.2, %v1154_v16 }
 0x1ad   :  { %v1101_v11 = vadd.f32 %v1100_v26, %v1072_v57 }
 0x1ae   :  { %v1205_v12 = vsel %vm1173_vm11, %v1154_v16, %v1189_v22 }
 0x1af   :  { %1221 = vst [vmem:[#allocation10 + $0x38] sm:$0xff] %v1205_v12  ;;  %v1127_v37 = vpop.f32.mrf.mxu2  ;;  %v1156_v20 = vpop.f32.mrf.mxu3 }
 0x1b0   :  { %v1128_v56 = vadd.f32 %v1127_v37, %v1099_v25 }
 0x1b2   :  { %v1157_v2 = vadd.f32 %v1156_v20, %v1128_v56  ;;  %v1074_v31 = vpop.f32.mrf.mxu0  ;;  %v1103_v33 = vpop.f32.mrf.mxu1 }
 0x1b3   :  { %v1075_v29 = vadd.f32 %v1074_v31, %v2050_v30 }
 0x1b4   :  { %vm1175_vm12 = vcmp.gt.f32.partialorder %v1157_v2, 0.0  ;;  %v1191_v24 = vmul.f32 0.2, %v1157_v2 }
 0x1b5   :  { %v1104_v35 = vadd.f32 %v1103_v33, %v1075_v29 }
 0x1b6   :  { %v1207_v23 = vsel %vm1175_vm12, %v1157_v2, %v1191_v24 }
 0x1b7   :  { %1223 = vst [vmem:[#allocation10 + $0x48] sm:$0xff] %v1207_v23  ;;  %v1129_v17 = vpop.f32.mrf.mxu2  ;;  %v1158_v28 = vpop.f32.mrf.mxu3 }
 0x1b8   :  { %v1130_v27 = vadd.f32 %v1129_v17, %v1101_v11 }
 0x1ba   :  { %v1159_v32 = vadd.f32 %v1158_v28, %v1130_v27  ;;  %v1076_v38 = vpop.f32.mrf.mxu0  ;;  %v1105_v45 = vpop.f32.mrf.mxu1 }
 0x1bb   :  { %v1077_v42 = vadd.f32 %v1076_v38, %v2050_v30 }
 0x1bc   :  { %vm1177_vm13 = vcmp.gt.f32.partialorder %v1159_v32, 0.0  ;;  %v1193_v34 = vmul.f32 0.2, %v1159_v32 }
 0x1bd   :  { %v1106_v41 = vadd.f32 %v1105_v45, %v1077_v42 }
 0x1be   :  { %v1209_v36 = vsel %vm1177_vm13, %v1159_v32, %v1193_v34 }
 0x1bf   :  { %1225 = vst [vmem:[#allocation10 + $0x58] sm:$0xff] %v1209_v36  ;;  %v1132_v39 = vpop.f32.mrf.mxu2  ;;  %v1161_v40 = vpop.f32.mrf.mxu3 }
 0x1c0   :  { %v1133_v0 = vadd.f32 %v1132_v39, %v1104_v35 }
 0x1c2   :  { %v1162_v43 = vadd.f32 %v1161_v40, %v1133_v0 }
 0x1c4   :  { %vm1179_vm14 = vcmp.gt.f32.partialorder %v1162_v43, 0.0  ;;  %v1195_v44 = vmul.f32 0.2, %v1162_v43 }
 0x1c6   :  { %v1211_v46 = vsel %vm1179_vm14, %v1162_v43, %v1195_v44 }
 0x1c7   :  { %1227 = vst [vmem:[#allocation10 + $0x68] sm:$0xff] %v1211_v46  ;;  %v1134_v47 = vpop.f32.mrf.mxu2  ;;  %v1163_v49 = vpop.f32.mrf.mxu3 }
 0x1c8   :  { %v1135_v48 = vadd.f32 %v1134_v47, %v1106_v41 }
 0x1ca   :  { %v1164_v50 = vadd.f32 %v1163_v49, %v1135_v48 }
 0x1cc   :  { %vm1181_vm15 = vcmp.gt.f32.partialorder %v1164_v50, 0.0  ;;  %v1197_v51 = vmul.f32 0.2, %v1164_v50 }
 0x1ce   :  { %v1213_v30 = vsel %vm1181_vm15, %v1164_v50, %v1197_v51 }
 0x1cf   :  { %1229 = vst [vmem:[#allocation10 + $0x78] sm:$0xff] %v1213_v30 }
 0x1d0   :  { %1242 = dma.vmem_to_hbm [thread:$0]  %s1235_s17, 2048, %s1237_s20, [#allocation4], %s1891_s26, %s1891_s26, %s1892_s27  }
 0x1d1   :  { %1888 = dma.done.wait [#allocation4], 2048  }
 0x1d2   :  { %1889 = vsyncadd [#allocation4], 4294965248 }
 0x1d3   :  { %1247 = vsyncpa [#allocation3], 1 }
 0x1d4   :  { %1248 = vsyncpa [#allocation6], 1 }
 0x1d5   :  { %1249 = vsyncpa [#allocation9], 1 }
 0x1d6   :  { %1250 = vsyncpa [#allocation4], 1 }

</bundles_post_ra>
